<compile_context>
chip_gen: v7x
topology: tpu7x:2x2x1
jax: 0.10.0
libtpu: 0.0.40
codegen_flags: <defaults>
</compile_context>

<pallas_src>
import functools

import jax
import jax.numpy as jnp
from jax.experimental import pallas as pl
from jax.experimental.pallas import tpu as pltpu

LANE = 128


def _round_up(x, m):
    return (x + m - 1) // m * m


def _vmem_limit_bytes():
    """Generation-aware VMEM budget: ~96 MiB on v5e/v6e (128 MiB physical),
    ~48 MiB on v7x (64 MiB per TensorCore). Conservative fallback if unknown."""
    try:
        cap = int(pltpu.get_tpu_info().vmem_capacity_bytes)
    except Exception:
        cap = 64 * 1024 * 1024
    return min(cap * 3 // 4, 100 * 1024 * 1024)


def _pick_batch_tile(B, L_ext, L_comp, D, n_sum, n_pad, k_max, vmem_limit):
    """Largest batch tile whose working set fits the VMEM budget."""
    bf16, f32 = 2, 4
    # Constant blocks (Pallas double-buffers them by default).
    # TODO(synk): mark these with pipeline_mode=pl.Buffered(1) to reclaim the second
    # buffer (v7x VMEM item) once single-buffered pipeline_mode is verified.
    fixed = 2 * (k_max * D * n_sum * bf16      # fused conv tap weights
                 + L_comp * n_sum * f32        # position mask
                 + n_sum * f32                 # conv bias
                 + n_sum * n_pad * f32         # decoder weight (f32)
                 + n_pad * f32)                # decoder bias
    # Per batch-row working set.
    per_row = (2 * L_ext * D * bf16            # x tile, double-buffered
               + L_comp * n_sum * f32          # f32 conv accumulator
               + 2 * L_comp * D * bf16         # live per-tap slice copies
               + 2 * n_pad * f32)              # output tile, double-buffered
    avail = vmem_limit - fixed - (4 << 20)     # scheduler / internal headroom
    tb = max(8, (avail // per_row) // 8 * 8)
    tb = min(tb, 256)                          # diminishing returns beyond ~256 rows
    tb = min(tb, _round_up(B, 8))              # do not over-pad tiny batches
    return int(tb)


def textcnn_kernel(k_max, x_ref, w_ref, mask_ref, cb_ref, dw_ref, db_ref, out_ref):
    """Fused TextCNN: (all convs as one GEMM) -> mask -> global max pool -> bias+ReLU -> linear.

      x_ref:    (TB, L_ext, 2E)      bf16
      w_ref:    (k_max, 2E, n_sum)   bf16   (tap j weights; taps >= k_i are zero for conv i)
      mask_ref: (L_comp, n_sum)      f32    (0 valid / -1e30 invalid window position)
      cb_ref:   (1, n_sum)           f32    conv bias (lane-padded)
      dw_ref:   (n_sum, n_pad)       f32    decoder weight
      db_ref:   (1, n_pad)           f32    decoder bias
      out_ref:  (TB, n_pad)          f32
    """
    TB = x_ref.shape[0]
    D = x_ref.shape[2]
    L_comp, n_sum = mask_ref.shape

    # One shallow (K = 2E) accumulating matmul per tap -- no im2col lane concat.
    # L_comp is a multiple of 8, so the reshapes are layout-preserving.
    def tap(j):
        xj = x_ref[:, j:j + L_comp, :].reshape(TB * L_comp, D)        # bf16
        return jnp.dot(xj, w_ref[j], preferred_element_type=jnp.float32)

    acc = tap(0)
    for j in range(1, k_max):                                          # static unroll (k_max small)
        acc = acc + tap(j)

    # Mask out-of-range window positions (per conv) before the global max pool.
    acc = acc.reshape(TB, L_comp, n_sum) + mask_ref[...][None, :, :]
    pooled = jnp.max(acc, axis=1)                                      # (TB, n_sum) f32

    # Bias + ReLU after the pool (exact: per-channel bias + monotonic ReLU).
    pooled = jnp.maximum(pooled + cb_ref[...], 0.0)

    # TODO(synk): training-mode dropout (pltpu.prng_* Bernoulli mask) omitted; identity == eval.
    logits = jnp.dot(pooled, dw_ref[...], preferred_element_type=jnp.float32) + db_ref[...]
    out_ref[...] = logits.astype(out_ref.dtype)


def textcnn_forward(token_ids, params, *, kernel_sizes, num_channels, num_classes):
    if len(kernel_sizes) != len(num_channels):
        raise ValueError("`num_channels` and `kernel_sizes` must have the same length.")
    E = params["embedding"].shape[1]
    D = 2 * E
    B, L = token_ids.shape
    k_max, k_min = max(kernel_sizes), min(kernel_sizes)
    if L < k_max:
        raise ValueError(f"sequence length {L} must be >= max kernel size {k_max}")

    # Padded conv-output length (multiple of 8) and extended input length so every
    # tap slice x[:, j:j+L_comp, :] stays in bounds.
    L_comp = _round_up(L - k_min + 1, 8)
    L_ext = L_comp + k_max - 1

    c_pads = [_round_up(c, LANE) for c in num_channels]
    n_sum = sum(c_pads)
    n_pad = _round_up(num_classes, LANE)

    # Generation-aware VMEM budget and batch tile derived from it.
    vmem_limit = _vmem_limit_bytes()
    tb = _pick_batch_tile(B, L_ext, L_comp, D, n_sum, n_pad, k_max, vmem_limit)

    # Concatenate the two embedding TABLES once (V, 2E) so a single gather yields the
    # already-concatenated features (no (B, L, 2E) concat pass).
    table = jnp.concatenate(
        [params["embedding"], params["constant_embedding"]], axis=1
    ).astype(jnp.bfloat16)                                             # (V, 2E) bf16
    x = jnp.take(table, token_ids, axis=0)                             # (B, L, 2E) bf16
    # TODO(synk): fuse the embedding gather into the kernel (scalar-prefetched ids +
    # VMEM-resident table) to cut the (B, L, 2E) HBM round trip.

    # Pad batch to a multiple of tb (full, unmasked tiles) and seq to L_ext.
    B_pad = _round_up(B, tb)
    x = jnp.pad(x, ((0, B_pad - B), (0, L_ext - L), (0, 0)))

    # --- pack fused conv weights / bias / position mask -----------------------------
    w_blocks, b_blocks, m_blocks = [], [], []
    pos = jnp.arange(L_comp)[:, None]                                  # (L_comp, 1)
    for i, (c, k, cpad) in enumerate(zip(num_channels, kernel_sizes, c_pads)):
        w = params["conv_w"][i]                                        # torch layout (C, 2E, k)
        wt = jnp.transpose(w, (2, 1, 0))                               # (k, 2E, C)
        wt = jnp.pad(wt, ((0, k_max - k), (0, 0), (0, cpad - c)))      # (k_max, 2E, cpad)
        w_blocks.append(wt)
        b_blocks.append(jnp.pad(params["conv_b"][i], (0, cpad - c)))
        valid = pos < (L - k + 1)
        m_blocks.append(jnp.broadcast_to(jnp.where(valid, 0.0, -1e30), (L_comp, cpad)))
    w_taps = jnp.concatenate(w_blocks, axis=2).astype(jnp.bfloat16)    # (k_max, 2E, n_sum)
    conv_b = jnp.concatenate(b_blocks).reshape(1, n_sum).astype(jnp.float32)
    pos_mask = jnp.concatenate(m_blocks, axis=1).astype(jnp.float32)   # (L_comp, n_sum)

    # Decoder: torch (num_classes, sum C) -> (n_sum, n_pad), block per conv, kept f32.
    dec_w = params["dec_w"]
    d_blocks, off = [], 0
    for c, cpad in zip(num_channels, c_pads):
        blk = dec_w[:, off:off + c].T                                  # (C, num_classes)
        d_blocks.append(jnp.pad(blk, ((0, cpad - c), (0, n_pad - num_classes))))
        off += c
    dec_w_p = jnp.concatenate(d_blocks, axis=0).astype(jnp.float32)    # (n_sum, n_pad)
    dec_b_p = jnp.pad(params["dec_b"], (0, n_pad - num_classes)
                      ).reshape(1, n_pad).astype(jnp.float32)

    # --- pallas_call -----------------------------------------------------------------
    grid = (B_pad // tb,)
    kernel = functools.partial(textcnn_kernel, k_max)

    out_padded = pl.pallas_call(
        kernel,
        out_shape=jax.ShapeDtypeStruct((B_pad, n_pad), jnp.float32),
        grid=grid,
        in_specs=[
            pl.BlockSpec((tb, L_ext, D), lambda i: (i, 0, 0)),          # x, batch-tiled
            pl.BlockSpec((k_max, D, n_sum), lambda i: (0, 0, 0)),       # fused conv taps
            pl.BlockSpec((L_comp, n_sum), lambda i: (0, 0)),            # position mask
            pl.BlockSpec((1, n_sum), lambda i: (0, 0)),                 # conv bias
            pl.BlockSpec((n_sum, n_pad), lambda i: (0, 0)),             # decoder weight
            pl.BlockSpec((1, n_pad), lambda i: (0, 0)),                 # decoder bias
        ],
        out_specs=pl.BlockSpec((tb, n_pad), lambda i: (i, 0)),
        compiler_params=pltpu.CompilerParams(
            dimension_semantics=("parallel",),       # batch grid shards over TCs (v7x)
            vmem_limit_bytes=int(vmem_limit),        # generation-dependent budget
        ),
    )(x, w_taps, pos_mask, conv_b, dec_w_p, dec_b_p)

    return out_padded[:B, :num_classes]


def textcnn_reference(token_ids, params, *, kernel_sizes, num_channels, num_classes):
    """Pure-JAX f32 reference mirroring the PyTorch forward exactly."""
    emb = jnp.take(params["embedding"], token_ids, axis=0)
    cemb = jnp.take(params["constant_embedding"], token_ids, axis=0)
    x = jnp.concatenate([emb, cemb], axis=-1).astype(jnp.float32)      # (B, L, 2E)
    B, L, _ = x.shape
    pooled_all = []
    for i, k in enumerate(kernel_sizes):
        w = params["conv_w"][i].astype(jnp.float32)                    # (C, 2E, k)
        b = params["conv_b"][i].astype(jnp.float32)                    # (C,)
        l_out = L - k + 1
        acc = jnp.zeros((B, l_out, num_channels[i]), jnp.float32)
        for j in range(k):
            acc = acc + jnp.einsum("bld,cd->blc", x[:, j:j + l_out, :], w[:, :, j])
        acc = acc + b[None, None, :]
        pooled_all.append(jnp.max(jnp.maximum(acc, 0.0), axis=1))
    enc = jnp.concatenate(pooled_all, axis=1)
    return enc @ params["dec_w"].T.astype(jnp.float32) + params["dec_b"].astype(jnp.float32)


if __name__ == "__main__":
    # small, deterministic config
    vocab_size = 50
    embedding_dim = 16                       # 2E = 32 feature lanes
    kernel_sizes = [3, 4, 5]
    num_channels = [8, 8, 8]
    num_classes = 2
    B, L = 2, 12

    key = jax.random.PRNGKey(0)
    keys = jax.random.split(key, 16)

    params = {
        "embedding": 0.1 * jax.random.normal(keys[0], (vocab_size, embedding_dim), jnp.float32),
        "constant_embedding": 0.1 * jax.random.normal(keys[1], (vocab_size, embedding_dim), jnp.float32),
        "conv_w": [
            0.1 * jax.random.normal(keys[2 + i], (c, 2 * embedding_dim, k), jnp.float32)
            for i, (c, k) in enumerate(zip(num_channels, kernel_sizes))
        ],
        "conv_b": [
            0.1 * jax.random.normal(keys[5 + i], (c,), jnp.float32)
            for i, c in enumerate(num_channels)
        ],
        "dec_w": 0.1 * jax.random.normal(keys[8], (num_classes, sum(num_channels)), jnp.float32),
        "dec_b": 0.1 * jax.random.normal(keys[9], (num_classes,), jnp.float32),
    }

    token_ids = jax.random.randint(keys[10], (B, L), 0, vocab_size, dtype=jnp.int32)

    out = textcnn_forward(
        token_ids, params,
        kernel_sizes=kernel_sizes, num_channels=num_channels, num_classes=num_classes)
    out = jax.block_until_ready(out)

    ref = textcnn_reference(
        token_ids, params,
        kernel_sizes=kernel_sizes, num_channels=num_channels, num_classes=num_classes)

    assert out.shape == (B, num_classes)
    # bf16 activations/weights with f32 accumulation -> loosened tolerance.
    assert jnp.allclose(out, ref, atol=2e-2, rtol=2e-2), (out, ref)
    print("KERNEL_OK")
</pallas_src>

<mosaic_0001>
module attributes {stable_mosaic.version = 11 : i64} {
  func.func @textcnn_kernel(%arg0: i32, %arg1: memref<8x20x32xbf16, #tpu.memory_space<vmem>>, %arg2: memref<5x32x384xbf16, #tpu.memory_space<vmem>>, %arg3: memref<16x384xf32, #tpu.memory_space<vmem>>, %arg4: memref<1x384xf32, #tpu.memory_space<vmem>>, %arg5: memref<384x128xf32, #tpu.memory_space<vmem>>, %arg6: memref<1x128xf32, #tpu.memory_space<vmem>>, %arg7: memref<8x128xf32, #tpu.memory_space<vmem>>) attributes {dimension_semantics = [#tpu.dimension_semantics<parallel>], iteration_bounds = array<i64: 1>, scalar_prefetch = 0 : i64, scratch_operands = 0 : i64, tpu.core_type = #tpu.core_type<tc>, window_params = [{transform_indices = @transform_0, window_bounds = array<i64: 8, 20, 32>}, {pipeline_mode = #tpu.pipeline_mode<synchronous>, transform_indices = @transform_1, window_bounds = array<i64: 5, 32, 384>}, {pipeline_mode = #tpu.pipeline_mode<synchronous>, transform_indices = @transform_2, window_bounds = array<i64: 16, 384>}, {pipeline_mode = #tpu.pipeline_mode<synchronous>, transform_indices = @transform_3, window_bounds = array<i64: 1, 384>}, {pipeline_mode = #tpu.pipeline_mode<synchronous>, transform_indices = @transform_4, window_bounds = array<i64: 384, 128>}, {pipeline_mode = #tpu.pipeline_mode<synchronous>, transform_indices = @transform_5, window_bounds = array<i64: 1, 128>}, {transform_indices = @transform_6, window_bounds = array<i64: 8, 128>}]} {
    %c0 = arith.constant 0 : index
    %c0_0 = arith.constant 0 : index
    %c0_1 = arith.constant 0 : index
    %0 = vector.load %arg1[%c0, %c0_0, %c0_1] : memref<8x20x32xbf16, #tpu.memory_space<vmem>>, vector<8x16x32xbf16>
    %1 = vector.shape_cast %0 : vector<8x16x32xbf16> to vector<128x32xbf16>
    %c0_2 = arith.constant 0 : index
    %c0_3 = arith.constant 0 : index
    %c0_4 = arith.constant 0 : index
    %2 = vector.load %arg2[%c0_2, %c0_3, %c0_4] : memref<5x32x384xbf16, #tpu.memory_space<vmem>>, vector<1x32x384xbf16>
    %3 = vector.shape_cast %2 : vector<1x32x384xbf16> to vector<32x384xbf16>
    %cst = arith.constant dense<0.000000e+00> : vector<128x384xf32>
    %4 = tpu.matmul %1, %3, %cst {dimension_numbers = #tpu.dot_dimension_numbers<[1], [0], [0], [1], [0, 0, 1, 1], [], []>} : vector<128x32xbf16>, vector<32x384xbf16>, vector<128x384xf32> -> vector<128x384xf32>
    %c0_5 = arith.constant 0 : index
    %c1 = arith.constant 1 : index
    %c0_6 = arith.constant 0 : index
    %5 = vector.load %arg1[%c0_5, %c1, %c0_6] : memref<8x20x32xbf16, #tpu.memory_space<vmem>>, vector<8x16x32xbf16>
    %6 = vector.shape_cast %5 : vector<8x16x32xbf16> to vector<128x32xbf16>
    %c1_7 = arith.constant 1 : index
    %c0_8 = arith.constant 0 : index
    %c0_9 = arith.constant 0 : index
    %7 = vector.load %arg2[%c1_7, %c0_8, %c0_9] : memref<5x32x384xbf16, #tpu.memory_space<vmem>>, vector<1x32x384xbf16>
    %8 = vector.shape_cast %7 : vector<1x32x384xbf16> to vector<32x384xbf16>
    %cst_10 = arith.constant dense<0.000000e+00> : vector<128x384xf32>
    %9 = tpu.matmul %6, %8, %cst_10 {dimension_numbers = #tpu.dot_dimension_numbers<[1], [0], [0], [1], [0, 0, 1, 1], [], []>} : vector<128x32xbf16>, vector<32x384xbf16>, vector<128x384xf32> -> vector<128x384xf32>
    %10 = arith.addf %4, %9 : vector<128x384xf32>
    %c0_11 = arith.constant 0 : index
    %c2 = arith.constant 2 : index
    %c0_12 = arith.constant 0 : index
    %11 = vector.load %arg1[%c0_11, %c2, %c0_12] : memref<8x20x32xbf16, #tpu.memory_space<vmem>>, vector<8x16x32xbf16>
    %12 = vector.shape_cast %11 : vector<8x16x32xbf16> to vector<128x32xbf16>
    %c2_13 = arith.constant 2 : index
    %c0_14 = arith.constant 0 : index
    %c0_15 = arith.constant 0 : index
    %13 = vector.load %arg2[%c2_13, %c0_14, %c0_15] : memref<5x32x384xbf16, #tpu.memory_space<vmem>>, vector<1x32x384xbf16>
    %14 = vector.shape_cast %13 : vector<1x32x384xbf16> to vector<32x384xbf16>
    %cst_16 = arith.constant dense<0.000000e+00> : vector<128x384xf32>
    %15 = tpu.matmul %12, %14, %cst_16 {dimension_numbers = #tpu.dot_dimension_numbers<[1], [0], [0], [1], [0, 0, 1, 1], [], []>} : vector<128x32xbf16>, vector<32x384xbf16>, vector<128x384xf32> -> vector<128x384xf32>
    %16 = arith.addf %10, %15 : vector<128x384xf32>
    %c0_17 = arith.constant 0 : index
    %c3 = arith.constant 3 : index
    %c0_18 = arith.constant 0 : index
    %17 = vector.load %arg1[%c0_17, %c3, %c0_18] : memref<8x20x32xbf16, #tpu.memory_space<vmem>>, vector<8x16x32xbf16>
    %18 = vector.shape_cast %17 : vector<8x16x32xbf16> to vector<128x32xbf16>
    %c3_19 = arith.constant 3 : index
    %c0_20 = arith.constant 0 : index
    %c0_21 = arith.constant 0 : index
    %19 = vector.load %arg2[%c3_19, %c0_20, %c0_21] : memref<5x32x384xbf16, #tpu.memory_space<vmem>>, vector<1x32x384xbf16>
    %20 = vector.shape_cast %19 : vector<1x32x384xbf16> to vector<32x384xbf16>
    %cst_22 = arith.constant dense<0.000000e+00> : vector<128x384xf32>
    %21 = tpu.matmul %18, %20, %cst_22 {dimension_numbers = #tpu.dot_dimension_numbers<[1], [0], [0], [1], [0, 0, 1, 1], [], []>} : vector<128x32xbf16>, vector<32x384xbf16>, vector<128x384xf32> -> vector<128x384xf32>
    %22 = arith.addf %16, %21 : vector<128x384xf32>
    %c0_23 = arith.constant 0 : index
    %c4 = arith.constant 4 : index
    %c0_24 = arith.constant 0 : index
    %23 = vector.load %arg1[%c0_23, %c4, %c0_24] : memref<8x20x32xbf16, #tpu.memory_space<vmem>>, vector<8x16x32xbf16>
    %24 = vector.shape_cast %23 : vector<8x16x32xbf16> to vector<128x32xbf16>
    %c4_25 = arith.constant 4 : index
    %c0_26 = arith.constant 0 : index
    %c0_27 = arith.constant 0 : index
    %25 = vector.load %arg2[%c4_25, %c0_26, %c0_27] : memref<5x32x384xbf16, #tpu.memory_space<vmem>>, vector<1x32x384xbf16>
    %26 = vector.shape_cast %25 : vector<1x32x384xbf16> to vector<32x384xbf16>
    %cst_28 = arith.constant dense<0.000000e+00> : vector<128x384xf32>
    %27 = tpu.matmul %24, %26, %cst_28 {dimension_numbers = #tpu.dot_dimension_numbers<[1], [0], [0], [1], [0, 0, 1, 1], [], []>} : vector<128x32xbf16>, vector<32x384xbf16>, vector<128x384xf32> -> vector<128x384xf32>
    %28 = arith.addf %22, %27 : vector<128x384xf32>
    %29 = vector.shape_cast %28 : vector<128x384xf32> to vector<8x16x384xf32>
    %c0_29 = arith.constant 0 : index
    %c0_30 = arith.constant 0 : index
    %30 = vector.load %arg3[%c0_29, %c0_30] : memref<16x384xf32, #tpu.memory_space<vmem>>, vector<16x384xf32>
    %31 = vector.shape_cast %30 : vector<16x384xf32> to vector<1x16x384xf32>
    %32 = vector.broadcast %31 : vector<1x16x384xf32> to vector<8x16x384xf32>
    %33 = arith.addf %29, %32 : vector<8x16x384xf32>
    %cst_31 = arith.constant dense<0xFF800000> : vector<8x384xf32>
    %34 = vector.multi_reduction <maximumf>, %33, %cst_31 [1] : vector<8x16x384xf32> to vector<8x384xf32>
    %c0_32 = arith.constant 0 : index
    %c0_33 = arith.constant 0 : index
    %35 = vector.load %arg4[%c0_32, %c0_33] : memref<1x384xf32, #tpu.memory_space<vmem>>, vector<1x384xf32>
    %36 = vector.broadcast %35 : vector<1x384xf32> to vector<8x384xf32>
    %37 = arith.addf %34, %36 : vector<8x384xf32>
    %cst_34 = arith.constant 0.000000e+00 : f32
    %38 = vector.broadcast %cst_34 : f32 to vector<8x384xf32>
    %39 = arith.maximumf %37, %38 : vector<8x384xf32>
    %c0_35 = arith.constant 0 : index
    %c0_36 = arith.constant 0 : index
    %40 = vector.load %arg5[%c0_35, %c0_36] : memref<384x128xf32, #tpu.memory_space<vmem>>, vector<384x128xf32>
    %cst_37 = arith.constant dense<0.000000e+00> : vector<8x128xf32>
    %41 = tpu.matmul %39, %40, %cst_37 {dimension_numbers = #tpu.dot_dimension_numbers<[1], [0], [0], [1], [0, 0, 1, 1], [], []>} : vector<8x384xf32>, vector<384x128xf32>, vector<8x128xf32> -> vector<8x128xf32>
    %c0_38 = arith.constant 0 : index
    %c0_39 = arith.constant 0 : index
    %42 = vector.load %arg6[%c0_38, %c0_39] : memref<1x128xf32, #tpu.memory_space<vmem>>, vector<1x128xf32>
    %43 = vector.broadcast %42 : vector<1x128xf32> to vector<8x128xf32>
    %44 = arith.addf %41, %43 : vector<8x128xf32>
    %c0_40 = arith.constant 0 : index
    %c0_41 = arith.constant 0 : index
    %45 = vector.load %arg7[%c0_40, %c0_41] : memref<8x128xf32, #tpu.memory_space<vmem>>, vector<8x128xf32>
    tpu.vector_store %arg7[%c0_40, %c0_41], %44 {strides = array<i32>} : memref<8x128xf32, #tpu.memory_space<vmem>>, vector<8x128xf32>,
    return
  }
  func.func @transform_0(%arg0: i32) -> (i32, i32, i32) {
    %c0_i32 = arith.constant 0 : i32
    %c0_i32_0 = arith.constant 0 : i32
    %c0_i32_1 = arith.constant 0 : i32
    return %arg0, %c0_i32, %c0_i32_0 : i32, i32, i32
  }
  func.func @transform_1(%arg0: i32) -> (i32, i32, i32) {
    %c0_i32 = arith.constant 0 : i32
    %c0_i32_0 = arith.constant 0 : i32
    %c0_i32_1 = arith.constant 0 : i32
    %c0_i32_2 = arith.constant 0 : i32
    return %c0_i32, %c0_i32_0, %c0_i32_1 : i32, i32, i32
  }
  func.func @transform_2(%arg0: i32) -> (i32, i32) {
    %c0_i32 = arith.constant 0 : i32
    %c0_i32_0 = arith.constant 0 : i32
    %c0_i32_1 = arith.constant 0 : i32
    return %c0_i32, %c0_i32_0 : i32, i32
  }
  func.func @transform_3(%arg0: i32) -> (i32, i32) {
    %c0_i32 = arith.constant 0 : i32
    %c0_i32_0 = arith.constant 0 : i32
    %c0_i32_1 = arith.constant 0 : i32
    return %c0_i32, %c0_i32_0 : i32, i32
  }
  func.func @transform_4(%arg0: i32) -> (i32, i32) {
    %c0_i32 = arith.constant 0 : i32
    %c0_i32_0 = arith.constant 0 : i32
    %c0_i32_1 = arith.constant 0 : i32
    return %c0_i32, %c0_i32_0 : i32, i32
  }
  func.func @transform_5(%arg0: i32) -> (i32, i32) {
    %c0_i32 = arith.constant 0 : i32
    %c0_i32_0 = arith.constant 0 : i32
    %c0_i32_1 = arith.constant 0 : i32
    return %c0_i32, %c0_i32_0 : i32, i32
  }
  func.func @transform_6(%arg0: i32) -> (i32, i32) {
    %c0_i32 = arith.constant 0 : i32
    %c0_i32_0 = arith.constant 0 : i32
    return %arg0, %c0_i32 : i32, i32
  }
}

</mosaic_0001>

<bundles_post_ra>
// kernel: tpu_custom_call.1
= control target key start
LH: loop header
LB: loop body
LE: loop exit
PB: predicated region body
PF: predicated region fallthrough
CT: control target
= control target key end

     0   :  { %11 = vsyncpa [#allocation3], 0  ;;  %s4857_s0 = inlined_call_operand.vmem [shape: bf16[8,20,32], index: 0, kind: input, shape index: {}]   ;;  %s4858_s1 = inlined_call_operand.hbm [shape: bf16[5,32,384], index: 1, kind: input, shape index: {}]   ;;  %s4859_s2 = inlined_call_operand.vmem [shape: f32[16,384], index: 2, kind: input, shape index: {}]   ;;  %s4860_s3 = inlined_call_operand.vmem [shape: f32[1,384], index: 3, kind: input, shape index: {}]   ;;  %s4861_s4 = inlined_call_operand.hbm [shape: f32[384,128], index: 4, kind: input, shape index: {}]   ;;  %s4862_s5 = inlined_call_operand.vmem [shape: f32[1,128], index: 5, kind: input, shape index: {}]   ;;  %s4863_s6 = inlined_call_operand.hbm [shape: f32[8,128], index: 6, kind: output, shape index: {}]  }
   0x1   :  { %12 = vsyncpa [#allocation6], 0 }
   0x2   :  { %13 = vsyncpa [#allocation4], 0  ;;  %s3648_s21 = smov [#allocation2]   ;;  %s3576_s25 = scalar_lea.hbm %s4858_s1, 3840 }
   0x3   :  { %s21_s22 = sshll.u32 %s3648_s21, 4  ;;  %p3577_p0 = scmp.ne.s32.totalorder %s4858_s1, %s3576_s25  ;;  %s22_s22 = int_to_ptr.vmem [resolvable:$true] %s21_s22 }
   0x4   :  { %p3580_p1 = scmp.lt.u32.totalorder %s3576_s25, %s4858_s1 }
   0x6   :  { %p3582_p2 = pnand %p3580_p1, %p3577_p0 }
   0x8   :  { %3585 = shalt.err (!%p3582_p2)
}
   0x9   :  { %s3586_s30 = scalar_lea.vmem %s22_s22, 3840  ;;  %p3591_p4 = scmp.lt.s32.totalorder %s22_s22, %s22_s22 }
   0xa   :  { %p3587_p3 = scmp.ne.s32.totalorder %s22_s22, %s3586_s30  ;;  %p3592_p5 = scmp.lt.s32.totalorder %s3586_s30, %s3586_s30 }
   0xc   :  { %p3593_p6 = por %p3592_p5, %p3591_p4 }
   0xe   :  { %p3594_p7 = pnand %p3593_p6, %p3587_p3 }
  0x10   :  { %3597 = shalt.err (!%p3594_p7)
}
  0x11   :  { %s3649_s7 = smov 192   ;;  %s3650_s8 = smov 12  }
  0x12   :  { %27 = dma.hbm_to_vmem [thread:$0]  %s4858_s1, 3840, %s22_s22, [#allocation3], %s3649_s7, %s3649_s7, %s3650_s8  }
  0x13   :  { %s3651_s11 = smov [#allocation5]   ;;  %s3598_s15 = scalar_lea.hbm %s4861_s4, 6144 }
  0x14   :  { %s37_s12 = sshll.u32 %s3651_s11, 4  ;;  %p3599_p8 = scmp.ne.s32.totalorder %s4861_s4, %s3598_s15  ;;  %s38_s12 = int_to_ptr.vmem [resolvable:$true] %s37_s12 }
  0x15   :  { %p3602_p9 = scmp.lt.u32.totalorder %s3598_s15, %s4861_s4 }
  0x17   :  { %p3604_p10 = pnand %p3602_p9, %p3599_p8 }
  0x19   :  { %3607 = shalt.err (!%p3604_p10)
}
  0x1a   :  { %s3608_s20 = scalar_lea.vmem %s38_s12, 6144  ;;  %p3613_p12 = scmp.lt.s32.totalorder %s38_s12, %s38_s12 }
  0x1b   :  { %p3609_p11 = scmp.ne.s32.totalorder %s38_s12, %s3608_s20  ;;  %p3614_p13 = scmp.lt.s32.totalorder %s3608_s20, %s3608_s20 }
  0x1d   :  { %p3615_p0 = por %p3614_p13, %p3613_p12 }
  0x1f   :  { %p3616_p1 = pnand %p3615_p0, %p3609_p11 }
  0x21   :  { %3619 = shalt.err (!%p3616_p1)
}
  0x22   :  { %s3652_s1 = smov 128   ;;  %s3653_s21 = smov 8  }
  0x23   :  { %43 = dma.hbm_to_vmem [thread:$0]  %s4861_s4, 6144, %s38_s12, [#allocation6], %s3652_s1, %s3652_s1, %s3653_s21  }
  0x24   :  { %3642 = dma.done.wait [#allocation3], 3840  }
  0x25   :  { %3643 = vsyncadd [#allocation3], 4294963456 }
  0x26   :  { %3644 = dma.done.wait [#allocation6], 6144  }
  0x27   :  { %3645 = vsyncadd [#allocation6], 4294961152  ;;  %v3654_v0 = vmov 0   ;;  %v3526_v1 = vld [vmem:[#allocation2 + $0x4] ss:$12 sps:$4 sm:$0xff]   ;;  %vm345_vm2 = vcmask 261120  }
  0x28   :  { %708 = vmatprep.mubr.bf16.mxu0 %v3654_v0  ;;  %402 = vmatprep.mubr.bf16.mxu1 %v3654_v0  ;;  %v3528_v2 = vld [vmem:[#allocation2 + $0x34] ss:$12 sps:$4 sm:$0xff]   ;;  %vm85_vm0 = vsmask.f32 3328  ;;  %v3531_v4 = vld [vmem:[#allocation2 + $0x30] ss:$12 sps:$4 sm:$0xff]  }
  0x29   :  { %676 = vmatprep.subr.bf16.mxu0 %v3526_v1  ;;  %v3530_v3 = vld [vmem:[#allocation2] ss:$12 sps:$4 sm:$0xff]   ;;  %370 = vmatprep.subr.bf16.mxu1 %v3528_v2  ;;  %v3532_v5 = vld [vmem:[#allocation2 + $0x1c] ss:$12 sps:$4 sm:$0xff]   ;;  %vm86_vm1 = vsmask.f32 7440 }
  0x2a   :  { %677 = vmatpush1.bf16.msra.mxu0 %v3530_v3  ;;  %371 = vmatpush1.bf16.msra.mxu1 %v3531_v4  ;;  %v3534_v6 = vld [vmem:[#allocation2 + $0x4c] ss:$12 sps:$4 sm:$0xff]   ;;  %v3537_v8 = vld [vmem:[#allocation2 + $0x48] ss:$12 sps:$4 sm:$0xff]   ;;  %v53_v9 = vld [vmem:[%s4857_s0] sm:$0xf] }
  0x2b   :  { %v3536_v7 = vld [vmem:[#allocation2 + $0x18] ss:$12 sps:$4 sm:$0xff]   ;;  %678 = vmatprep.subr.bf16.mxu0 %v3532_v5  ;;  %372 = vmatprep.subr.bf16.mxu1 %v3534_v6  ;;  %v89_v11 = vshrl.u32 %v53_v9, 16  ;;  %v92_v12 = vshll.u32 %v53_v9, 16  ;;  %v3539_v14 = vld [vmem:[#allocation2 + $0x60] ss:$12 sps:$4 sm:$0xff]   ;;  %vm3751_vm3 = vmor %vm85_vm0, %vm86_vm1 }
  0x2c   :  { %v3726_v10 = vld [vmem:[%s4857_s0 + $0x4] sm:$0xf]  ;;  %v3735_v19 = vld [vmem:[%s4857_s0 + $0x8] sm:$0x1]  ;;  %v55_v23 = vld [vmem:[%s4857_s0 + $0xc] sm:$0xf] }
  0x2d   :  { %v3729_v13 = vcombine.low %v53_v9, %v3726_v10  ;;  %v3541_v15 = vld [vmem:[#allocation2 + $0x64] ss:$12 sps:$4 sm:$0xff]   ;;  %v98_v16 = vshll.u32 %v3726_v10, 16  ;;  %v91_v17 = vrot.slane %v89_v11, 4  ;;  %v94_v18 = vrot.slane %v92_v12, 5  ;;  %s3658_s8 = smov [#allocation7]  }
  0x2e   :  { %679 = vmatpush1.bf16.msra.mxu0 %v3536_v7  ;;  %373 = vmatpush1.bf16.msra.mxu1 %v3537_v8  ;;  %v102_v20 = vshrl.u32 %v3726_v10, 16  ;;  %v108_v22 = vshll.u32 %v3735_v19, 16  ;;  %v3745_v28 = vld [vmem:[%s4857_s0 + $0x10] sm:$0xf]  ;;  %v113_v30 = vshrl.u32 %v55_v23, 16  ;;  %v116_v31 = vshll.u32 %v55_v23, 16 }
  0x2f   :  { %1058 = vmatprep.subr.bf16.mxu0 %v3541_v15  ;;  %v100_v21 = vrot.slane %v98_v16, 5  ;;  %v95_v24 = vor.u32 %v94_v18, %v91_v17  ;;  %v1337_v27 = vrot.slane %v98_v16, 6  ;;  %v3761_v36 = vld [vmem:[%s4857_s0 + $0x14] sm:$0x1]  ;;  %v122_v39 = vshll.u32 %v3745_v28, 16  ;;  %s2853_s9 = sshll.u32 %s3658_s8, 4  ;;  %s2854_s9 = int_to_ptr.vmem [resolvable:$true] %s2853_s9 }
  0x30   :  { %v104_v25 = vrot.slane %v102_v20, 4  ;;  %v1336_v26 = vrot.slane %v102_v20, 5  ;;  %v110_v34 = vrot.slane %v108_v22, 5  ;;  %v115_v37 = vrot.slane %v113_v30, 4  ;;  %v57_v41 = vld [vmem:[%s4857_s0 + $0x18] sm:$0xf]  ;;  %p3625_p3 = scmp.lt.s32.totalorder %s2854_s9, %s2854_s9 }
  0x31   :  { %2907 = vmatmul.mubr.msk.bf16.vlgmr.msra.gmra.mrb[0].mxu0 %vm345_vm2, %v3729_v13  ;;  %v96_v32 = vrot.slane %v95_v24, 4  ;;  %v118_v38 = vrot.slane %v116_v31, 5  ;;  %v126_v40 = vshrl.u32 %v3745_v28, 16  ;;  %v3771_v44 = vcombine.low %v55_v23, %v3745_v28  ;;  %v3781_v49 = vld [vmem:[%s4857_s0 + $0x1c] sm:$0xf]  ;;  %s3620_s10 = scalar_lea.vmem %s2854_s9, 128 }
  0x32   :  { %v105_v33 = vor.u32 %v104_v25, %v100_v21  ;;  %v3755_v35 = vor.u32 %v1337_v27, %v1336_v26  ;;  %1059 = vmatpush1.bf16.msra.mxu0 %v3539_v14  ;;  %718 = vmatprep.mubr.bf16.mxu0 %v3654_v0  ;;  %v124_v46 = vrot.slane %v122_v39, 5  ;;  %v132_v48 = vshll.u32 %v3761_v36, 16  ;;  %v3788_v53 = vld [vmem:[%s4857_s0 + $0x20] sm:$0x1]  ;;  %v59_v54 = vld [vmem:[%s4857_s0 + $0x24] sm:$0xf]  ;;  %p3621_p2 = scmp.ne.s32.totalorder %s2854_s9, %s3620_s10  ;;  %p3626_p4 = scmp.lt.s32.totalorder %s3620_s10, %s3620_s10 }
  0x33   :  { %v101_v42 = vsel %vm3751_vm3, %v96_v32, %v100_v21  ;;  %v119_v45 = vor.u32 %v118_v38, %v115_v37  ;;  %v128_v47 = vrot.slane %v126_v40, 4  ;;  %v137_v51 = vshrl.u32 %v57_v41, 16  ;;  %v3546_v59 = vld [vmem:[#allocation2 + $0x78] ss:$12 sps:$4 sm:$0xff]   ;;  %v3548_v1 = vld [vmem:[#allocation2 + $0x7c] ss:$12 sps:$4 sm:$0xff]  }
  0x34   :  { %v106_v43 = vrot.slane %v105_v33, 4  ;;  %v140_v52 = vshll.u32 %v57_v41, 16  ;;  %v134_v58 = vrot.slane %v132_v48, 5  ;;  %v146_v62 = vshll.u32 %v3781_v49, 16  ;;  %v3813_v9 = vld [vmem:[%s4857_s0 + $0x28] sm:$0xf]  ;;  %1060 = vmatprep.subr.bf16.mxu0 %v3548_v1  ;;  %p3627_p5 = por %p3626_p4, %p3625_p3 }
  0x35   :  { %v120_v56 = vrot.slane %v119_v45, 4  ;;  %v129_v57 = vor.u32 %v128_v47, %v124_v46  ;;  %v139_v60 = vrot.slane %v137_v51, 4  ;;  %v150_v63 = vshrl.u32 %v3781_v49, 16  ;;  %v3825_v21 = vld [vmem:[%s4857_s0 + $0x2c] sm:$0x1] }
  0x36   :  { %v111_v50 = vsel %vm3751_vm3, %v106_v43, %v110_v34  ;;  %v142_v61 = vrot.slane %v140_v52, 5  ;;  %v156_v4 = vshll.u32 %v3788_v53, 16  ;;  %v161_v5 = vshrl.u32 %v59_v54, 16  ;;  %1061 = vmatpush1.bf16.msra.mxu0 %v3546_v59  ;;  %v61_v26 = vld [vmem:[%s4857_s0 + $0x30] sm:$0xf]  ;;  %p3628_p6 = pnand %p3627_p5, %p3621_p2 }
  0x37   :  { %v3793_v55 = vcombine.low %v101_v42, %v111_v50  ;;  %v125_v2 = vsel %vm3751_vm3, %v120_v56, %v124_v46  ;;  %v130_v3 = vrot.slane %v129_v57, 4  ;;  %v148_v7 = vrot.slane %v146_v62, 5  ;;  %v3839_v31 = vld [vmem:[%s4857_s0 + $0x34] sm:$0xf]  ;;  %v3553_v47 = vld [vmem:[#allocation2 + $0x50] ss:$12 sps:$4 sm:$0xff]  }
  0x38   :  { %v143_v6 = vor.u32 %v142_v61, %v139_v60  ;;  %v152_v8 = vrot.slane %v150_v63, 4  ;;  %v164_v11 = vshll.u32 %v59_v54, 16  ;;  %v3820_v15 = vcombine.low %v57_v41, %v3781_v49  ;;  %v3552_v41 = vld [vmem:[#allocation2 + $0x38] ss:$12 sps:$4 sm:$0xff]   ;;  %v63_v50 = vld [vmem:[%s4857_s0 + $0x3c] sm:$0xf] }
  0x39   :  { %2877 = vmatmul.mubr.msk.bf16.vlgmr.msra.gmra.mrb[0].mxu1 %vm345_vm2, %v3793_v55  ;;  %2908 = vmatmul.mubr.msk.bf16.gmra.mrb[4].mxu0 %vm345_vm2, %v3771_v44  ;;  %v135_v12 = vsel %vm3751_vm3, %v130_v3, %v134_v58  ;;  %v163_v17 = vrot.slane %v161_v5, 4  ;;  %v170_v22 = vshll.u32 %v3813_v9, 16  ;;  %v174_v23 = vshrl.u32 %v3813_v9, 16  ;;  %v3556_v58 = vld [vmem:[#allocation2 + $0x94] ss:$12 sps:$4 sm:$0xff]  }
  0x3a   :  { %412 = vmatprep.mubr.bf16.mxu1 %v3654_v0  ;;  %728 = vmatprep.mubr.bf16.mxu0 %v3654_v0  ;;  %v3817_v14 = vcombine.low %v125_v2, %v135_v12  ;;  %v153_v16 = vor.u32 %v152_v8, %v148_v7  ;;  %v144_v18 = vrot.slane %v143_v6, 4  ;;  %v166_v20 = vrot.slane %v164_v11, 5  ;;  %v3865_v61 = vld [vmem:[%s4857_s0 + $0x38] sm:$0x1]  ;;  %v3874_v2 = vld [vmem:[%s4857_s0 + $0x40] sm:$0xf] }
  0x3b   :  { %v158_v25 = vrot.slane %v156_v4, 5  ;;  %v172_v27 = vrot.slane %v170_v22, 5  ;;  %v176_v30 = vrot.slane %v174_v23, 4  ;;  %v180_v32 = vshll.u32 %v3825_v21, 16  ;;  %3132 = vmatprep.subr.bf16.mxu1 %v3552_v41  ;;  %1600 = vmatprep.subr.bf16.mxu0 %v3556_v58  ;;  %v3883_v8 = vld [vmem:[#allocation2 + $0x8] ss:$12 sps:$4 sm:$0xff]  }
  0x3c   :  { %v154_v24 = vrot.slane %v153_v16, 4  ;;  %v149_v33 = vsel %vm3751_vm3, %v144_v18, %v148_v7  ;;  %v167_v34 = vor.u32 %v166_v20, %v163_v17  ;;  %v185_v37 = vshrl.u32 %v61_v26, 16  ;;  %3133 = vmatpush3.bf16.msra.mxu1 %v3552_v41 }
  0x3d   :  { %v188_v38 = vshll.u32 %v61_v26, 16  ;;  %v177_v43 = vor.u32 %v176_v30, %v172_v27  ;;  %v194_v45 = vshll.u32 %v3839_v31, 16  ;;  %v198_v46 = vshrl.u32 %v3839_v31, 16  ;;  %3134 = vmatprep.subr.bf16.mxu1 %v3553_v47  ;;  %v3900_v30 = vld [vmem:[%s4857_s0 + $0x44] sm:$0x1] }
  0x3e   :  { %v159_v42 = vsel %vm3751_vm3, %v154_v24, %v158_v25  ;;  %v3855_v48 = vcombine.low %v59_v54, %v3813_v9  ;;  %v168_v52 = vrot.slane %v167_v34, 4  ;;  %v187_v56 = vrot.slane %v185_v37, 4 }
  0x3f   :  { %v3860_v51 = vcombine.low %v149_v33, %v159_v42  ;;  %v190_v57 = vrot.slane %v188_v38, 5  ;;  %v178_v59 = vrot.slane %v177_v43, 4  ;;  %v182_v60 = vrot.slane %v180_v32, 5  ;;  %v65_v38 = vld [vmem:[%s4857_s0 + $0x48] sm:$0xf] }
  0x40   :  { %v196_v54 = vrot.slane %v194_v45, 5  ;;  %v200_v1 = vrot.slane %v198_v46, 4  ;;  %v209_v3 = vshrl.u32 %v63_v50, 16  ;;  %v212_v4 = vshll.u32 %v63_v50, 16  ;;  %3135 = vmatpush3.bf16.msra.mxu1 %v3553_v47 }
  0x41   :  { %2878 = vmatmul.mubr.msk.bf16.gmra.mrb[4].mxu1 %vm345_vm2, %v3817_v14  ;;  %2909 = vmatmul.mubr.msk.bf16.gmra.mrb[8].mxu0 %vm345_vm2, %v3820_v15  ;;  %v173_v5 = vsel %vm3751_vm3, %v168_v52, %v172_v27  ;;  %v191_v6 = vor.u32 %v190_v57, %v187_v56  ;;  %v204_v7 = vshll.u32 %v3865_v61, 16  ;;  %v183_v11 = vsel %vm3751_vm3, %v178_v59, %v182_v60 }
  0x42   :  { %422 = vmatprep.mubr.bf16.mxu1 %v3654_v0  ;;  %738 = vmatprep.mubr.bf16.mxu0 %v3654_v0  ;;  %v201_v12 = vor.u32 %v200_v1, %v196_v54  ;;  %v218_v16 = vshll.u32 %v3874_v2, 16  ;;  %v222_v17 = vshrl.u32 %v3874_v2, 16  ;;  %v211_v18 = vrot.slane %v209_v3, 4 }
  0x43   :  { %3152 = vmatprep.subr.bf16.mxu1 %v3883_v8  ;;  %v214_v20 = vrot.slane %v212_v4, 5  ;;  %v3892_v24 = vcombine.low %v173_v5, %v183_v11  ;;  %v3895_v25 = vcombine.low %v61_v26, %v3839_v31  ;;  %v192_v27 = vrot.slane %v191_v6, 4  ;;  %v3912_v26 = vld [vmem:[%s4857_s0 + $0x4c] sm:$0xf]  ;;  %v3935_v5 = vld [vmem:[%s4857_s0 + $0x50] sm:$0x1] }
  0x44   :  { %v202_v32 = vrot.slane %v201_v12, 4  ;;  %v206_v33 = vrot.slane %v204_v7, 5  ;;  %v220_v34 = vrot.slane %v218_v16, 5  ;;  %v224_v37 = vrot.slane %v222_v17, 4 }
  0x45   :  { %v215_v41 = vor.u32 %v214_v20, %v211_v18  ;;  %v197_v42 = vsel %vm3751_vm3, %v192_v27, %v196_v54  ;;  %v228_v43 = vshll.u32 %v3900_v30, 16  ;;  %v233_v47 = vshrl.u32 %v65_v38, 16  ;;  %v3947_v18 = vld [vmem:[%s4857_s0 + $0x58] sm:$0xf] }
  0x46   :  { %v236_v52 = vshll.u32 %v65_v38, 16  ;;  %v207_v56 = vsel %vm3751_vm3, %v202_v32, %v206_v33  ;;  %v225_v57 = vor.u32 %v224_v37, %v220_v34  ;;  %v4866_v58 = vshll.u32 %v3912_v26, 16 }
  0x47   :  { %v246_v59 = vshrl.u32 %v3912_v26, 16  ;;  %v216_v60 = vrot.slane %v215_v41, 4  ;;  %v3927_v1 = vcombine.low %v197_v42, %v207_v56  ;;  %v3930_v54 = vcombine.low %v63_v50, %v3874_v2  ;;  %v67_v50 = vld [vmem:[%s4857_s0 + $0x54] sm:$0xf] }
  0x48   :  { %v235_v3 = vrot.slane %v233_v47, 4  ;;  %v238_v4 = vrot.slane %v236_v52, 5  ;;  %v226_v6 = vrot.slane %v225_v57, 4  ;;  %v230_v7 = vrot.slane %v228_v43, 5 }
  0x49   :  { %2879 = vmatmul.mubr.msk.bf16.gmra.mrb[8].mxu1 %vm345_vm2, %v3860_v51  ;;  %2910 = vmatmul.mubr.msk.bf16.gmra.mrb[12].mxu0 %vm345_vm2, %v3855_v48  ;;  %v244_v11 = vrot.slane %v4866_v58, 5  ;;  %v248_v12 = vrot.slane %v246_v59, 4  ;;  %v221_v20 = vsel %vm3751_vm3, %v216_v60, %v220_v34  ;;  %v252_v32 = vshll.u32 %v3935_v5, 16 }
  0x4a   :  { %432 = vmatprep.mubr.bf16.mxu1 %v3654_v0  ;;  %748 = vmatprep.mubr.bf16.mxu0 %v3654_v0  ;;  %v239_v27 = vor.u32 %v238_v4, %v235_v3  ;;  %v257_v33 = vshrl.u32 %v67_v50, 16  ;;  %v260_v37 = vshll.u32 %v67_v50, 16  ;;  %v231_v41 = vsel %vm3751_vm3, %v226_v6, %v230_v7 }
  0x4b   :  { %v249_v42 = vor.u32 %v248_v12, %v244_v11  ;;  %v4864_v34 = vshll.u32 %v3947_v18, 16  ;;  %v4865_v43 = vshrl.u32 %v3947_v18, 16  ;;  %v3963_v47 = vcombine.low %v65_v38, %v3912_v26  ;;  %v3974_v12 = vld [vmem:[%s4857_s0 + $0x5c] sm:$0x1] }
  0x4c   :  { %v3965_v52 = vcombine.low %v221_v20, %v231_v41  ;;  %v240_v56 = vrot.slane %v239_v27, 4  ;;  %v254_v57 = vrot.slane %v252_v32, 5  ;;  %v259_v60 = vrot.slane %v257_v33, 4  ;;  %v3991_v41 = vld [vmem:[%s4857_s0] sm:$0xe] }
  0x4d   :  { %v250_v3 = vrot.slane %v249_v42, 4  ;;  %v262_v4 = vrot.slane %v260_v37, 5  ;;  %v268_v6 = vrot.slane %v4864_v34, 5  ;;  %v272_v7 = vrot.slane %v4865_v43, 4 }
  0x4e   :  { %v915_v38 = vrot.slane %v3726_v10, 5  ;;  %v245_v20 = vsel %vm3751_vm3, %v240_v56, %v244_v11  ;;  %v276_v37 = vshll.u32 %v3974_v12, 16  ;;  %vm910_vm4 = vcmask 1042432  }
  0x4f   :  { %v255_v27 = vsel %vm3751_vm3, %v250_v3, %v254_v57  ;;  %v263_v32 = vor.u32 %v262_v4, %v259_v60  ;;  %v273_v33 = vor.u32 %v272_v7, %v268_v6  ;;  %vm911_vm5 = vcmask 1046532  }
  0x50   :  { %v1359_v11 = vrot.slane %v126_v40, 5  ;;  %v917_v42 = vrot.slane %v915_v38, 4  ;;  %v1360_v56 = vrot.slane %v122_v39, 6  ;;  %v918_v57 = vrot.slane %v3735_v19, 5  ;;  %vm4004_vm6 = vmor %vm910_vm4, %vm911_vm5 }
  0x51   :  { %2880 = vmatmul.mubr.msk.bf16.gmra.mrb[12].mxu1 %vm345_vm2, %v3892_v24  ;;  %2911 = vmatmul.mubr.msk.bf16.gmra.mrb[16].mxu0 %vm345_vm2, %v3895_v25  ;;  %v3998_v60 = vcombine.low %v245_v20, %v255_v27  ;;  %v4001_v3 = vcombine.low %v67_v50, %v3947_v18  ;;  %v2923_v4 = vrot.slane %v3991_v41, 9  ;;  %v264_v7 = vrot.slane %v263_v32, 4  ;;  %v4031_v32 = vld [vmem:[%s4857_s0 + $0xc] sm:$0xe] }
  0x52   :  { %442 = vmatprep.mubr.bf16.mxu1 %v3654_v0  ;;  %758 = vmatprep.mubr.bf16.mxu0 %v3654_v0  ;;  %v274_v34 = vrot.slane %v273_v33, 4  ;;  %v278_v43 = vrot.slane %v276_v37, 5  ;;  %v4008_v40 = vor.u32 %v1360_v56, %v1359_v11  ;;  %v1382_v39 = vrot.slane %v150_v63, 5  ;;  %v3561_v56 = vld [vmem:[#allocation2 + $0xac] ss:$12 sps:$4 sm:$0xff]  }
  0x53   :  { %v919_v19 = vsel %vm4004_vm6, %v917_v42, %v918_v57  ;;  %v1383_v50 = vrot.slane %v146_v62, 6  ;;  %v269_v20 = vsel %vm3751_vm3, %v264_v7, %v268_v6  ;;  %v916_v27 = vsel %vm4004_vm6, %v2923_v4, %v915_v38 }
  0x54   :  { %v279_v63 = vsel %vm3751_vm3, %v274_v34, %v278_v43  ;;  %v922_v62 = vrot.slane %v3745_v28, 5  ;;  %v4038_v6 = vcombine.low %v916_v27, %v919_v19  ;;  %v2924_v29 = vrot.slane %v4031_v32, 9  ;;  %v3554_v43 = vld [vmem:[#allocation2 + $0x90] ss:$12 sps:$4 sm:$0xff]   ;;  %v4067_v19 = vld [vmem:[%s4857_s0 + $0x18] sm:$0xe] }
  0x55   :  { %v4034_v33 = vor.u32 %v1383_v50, %v1382_v39  ;;  %v4036_v37 = vcombine.low %v269_v20, %v279_v63  ;;  %v1405_v34 = vrot.slane %v174_v23, 5  ;;  %v925_v11 = vrot.slane %v3761_v36, 5  ;;  %v3559_v23 = vld [vmem:[#allocation2 + $0xa8] ss:$12 sps:$4 sm:$0xff]  }
  0x56   :  { %v924_v38 = vrot.slane %v922_v62, 4  ;;  %v1406_v42 = vrot.slane %v170_v22, 6  ;;  %v923_v4 = vsel %vm4004_vm6, %v2924_v29, %v922_v62  ;;  %v929_v22 = vrot.slane %v3781_v49, 5  ;;  %v3558_v62 = vld [vmem:[#allocation2 + $0x20] ss:$12 sps:$4 sm:$0xff]  }
  0x57   :  { %v1428_v7 = vrot.slane %v198_v46, 5  ;;  %v1429_v39 = vrot.slane %v194_v45, 6  ;;  %v2925_v49 = vrot.slane %v4067_v19, 9  ;;  %v932_v46 = vrot.slane %v3788_v53, 5 }
  0x58   :  { %v4046_v57 = vor.u32 %v1406_v42, %v1405_v34  ;;  %v926_v36 = vsel %vm4004_vm6, %v924_v38, %v925_v11  ;;  %v931_v63 = vrot.slane %v929_v22, 4  ;;  %v1451_v45 = vrot.slane %v222_v17, 5  ;;  %v4098_v34 = vld [vmem:[%s4857_s0 + $0x24] sm:$0xe]  ;;  %v4104_v38 = vld [vmem:[#allocation2 + $0x68] ss:$12 sps:$4 sm:$0xff]  }
  0x59   :  { %2881 = vmatmul.mubr.msk.bf16.gmra.mrb[16].mxu1 %vm345_vm2, %v3927_v1  ;;  %2912 = vmatmul.mubr.msk.bf16.gmra.mrb[20].mxu0 %vm345_vm2, %v3930_v54  ;;  %v4069_v50 = vor.u32 %v1429_v39, %v1428_v7  ;;  %v4071_v20 = vcombine.low %v923_v4, %v926_v36  ;;  %v1452_v27 = vrot.slane %v218_v16, 6  ;;  %v1474_v53 = vrot.slane %v246_v59, 5 }
  0x5a   :  { %452 = vmatprep.mubr.bf16.mxu1 %v3654_v0  ;;  %768 = vmatprep.mubr.bf16.mxu0 %v3654_v0  ;;  %v930_v16 = vsel %vm4004_vm6, %v2925_v49, %v929_v22  ;;  %v933_v17 = vsel %vm4004_vm6, %v931_v63, %v932_v46  ;;  %v4874_v59 = vshll.u32 %v3912_v26, 16  ;;  %v1887_v11 = vrot.slane %v3726_v10, 6  ;;  %v1859_v49 = vld [vmem:[%s4857_s0 + $0xc] sm:$0xc]  ;;  %v4144_v46 = vld [vmem:[%s4857_s0 + $0x30] sm:$0xe] }
  0x5b   :  { %v4083_v29 = vor.u32 %v1452_v27, %v1451_v45  ;;  %v4107_v42 = vcombine.low %v930_v16, %v933_v17  ;;  %v939_v36 = vrot.slane %v3825_v21, 5  ;;  %v4876_v7 = vshll.u32 %v3947_v18, 16  ;;  %v1858_v21 = vld [vmem:[%s4857_s0] sm:$0xc]  ;;  %v4150_v27 = vld [vmem:[%s4857_s0 + $0x8] sm:$0x3] }
  0x5c   :  { %vm1882_vm7 = vcmask 1041408   ;;  %vm1883_vm8 = vcmask 1045508   ;;  %v943_v45 = vrot.slane %v3839_v31, 5  ;;  %v1890_v16 = vrot.slane %v4150_v27, 6 }
  0x5d   :  { %v1498_v39 = vrot.slane %v4876_v7, 6  ;;  %vm4154_vm9 = vmor %vm1882_vm7, %vm1883_vm8  ;;  %v2992_v17 = vrot.slane %v1859_v49, 10  ;;  %vm1324_vm10 = vsmask.f32 2304  ;;  %vm1325_vm11 = vsmask.f32 6416 }
  0x5e   :  { %vm4264_vm12 = vmor %vm1324_vm10, %vm1325_vm11  ;;  %vm2655_vm13 = vcmask 1041409   ;;  %vm2658_vm14 = vcmask 1042434   ;;  %vm2661_vm15 = vcmask 1043459   ;;  %vm2664_vm0 = vcmask 1044484  }
  0x5f   :  { %vm2667_vm1 = vcmask 1045509   ;;  %vm2673_vm3 = vcmask 1047559   ;;  %vm3656_vm4 = vmmov 0  }
  0x61   :  { %2882 = vmatmul.mubr.msk.bf16.gmra.mrb[20].mxu1 %vm345_vm2, %v3965_v52  ;;  %2913 = vmatmul.mubr.msk.bf16.gmra.mrb[24].mxu0 %vm345_vm2, %v3963_v47 }
  0x62   :  { %462 = vmatprep.mubr.bf16.mxu1 %v3654_v0  ;;  %778 = vmatprep.mubr.bf16.mxu0 %v3654_v0 }
  0x69   :  { %2883 = vmatmul.mubr.msk.bf16.gmra.mrb[24].mxu1 %vm345_vm2, %v3998_v60  ;;  %2914 = vmatmul.mubr.msk.bf16.gmra.mrb[28].mxu0 %vm345_vm2, %v4001_v3 }
  0x6a   :  { %472 = vmatprep.mubr.bf16.mxu1 %v3654_v0  ;;  %1090 = vmatprep.mubr.bf16.mxu0 %v3654_v0 }
  0x71   :  { %2884 = vmatmul.mubr.msk.bf16.gmra.mrb[28].mxu1 %vm345_vm2, %v4036_v37  ;;  %2945 = vmatmul.mubr.msk.bf16.vlgmr.msra.gmra.mrb[0].mxu0 %vm345_vm2, %v4038_v6 }
  0x72   :  { %3136 = vmatprep.mubr.msk.bf16.mxu1 %vm345_vm2, %v3793_v55  ;;  %1601 = vmatpush1.bf16.msra.mxu0 %v3554_v43  ;;  %v3566_v55 = vld [vmem:[#allocation2 + $0xc4] ss:$12 sps:$4 sm:$0xff]   ;;  %v1894_v43 = vrot.slane %v3745_v28, 6  ;;  %v4118_v28 = vld [vmem:[%s4857_s0 + $0x14] sm:$0x3] }
  0x73   :  { %1100 = vmatprep.mubr.bf16.mxu0 %v3654_v0  ;;  %1602 = vmatprep.subr.bf16.mxu0 %v3561_v56  ;;  %v2926_v56 = vrot.slane %v4098_v34, 9  ;;  %v1897_v10 = vrot.slane %v4118_v28, 6 }
  0x74   :  { %v1895_v7 = vsel %vm4154_vm9, %v2992_v17, %v1894_v43 }
  0x76   :  { %1603 = vmatpush1.bf16.msra.mxu0 %v3559_v23  ;;  %v1896_v23 = vrot.slane %v1894_v43, 4  ;;  %v950_v43 = vrot.slane %v3874_v2, 5 }
  0x77   :  { %2030 = vmatprep.subr.bf16.mxu0 %v3566_v55  ;;  %v1889_v55 = vrot.slane %v1887_v11, 4 }
  0x79   :  { %3137 = vmatmul.mubr.msk.bf16.vlgmr.msra.gmra.mrb[32].mxu1 %vm345_vm2, %v3817_v14  ;;  %2946 = vmatmul.mubr.msk.bf16.gmra.mrb[4].mxu0 %vm345_vm2, %v4071_v20  ;;  %v936_v14 = vrot.slane %v3813_v9, 5 }
  0x7a   :  { %3140 = vmatprep.mubr.msk.bf16.mxu1 %vm345_vm2, %v3860_v51  ;;  %1110 = vmatprep.mubr.bf16.mxu0 %v3654_v0  ;;  %v1475_v51 = vrot.slane %v4874_v59, 6 }
  0x7b   :  { %3153 = vmatpush3.bf16.msra.mxu1 %v3883_v8  ;;  %v938_v4 = vrot.slane %v936_v14, 4  ;;  %v4875_v8 = vshrl.u32 %v3947_v18, 16  ;;  %v937_v63 = vsel %vm4004_vm6, %v2926_v56, %v936_v14  ;;  %v1898_v14 = vsel %vm4154_vm9, %v1896_v23, %v1897_v10 }
  0x7c   :  { %3154 = vmatprep.subr.bf16.mxu1 %v3558_v62  ;;  %v4109_v9 = vor.u32 %v1475_v51, %v1474_v53  ;;  %v2991_v53 = vrot.slane %v1858_v21, 10  ;;  %v2927_v51 = vrot.slane %v4144_v46, 9  ;;  %v953_v21 = vrot.slane %v3900_v30, 5  ;;  %v4211_v30 = vld [vmem:[%s4857_s0 + $0x48] sm:$0xe] }
  0x7d   :  { %v1497_v22 = vrot.slane %v4875_v8, 5  ;;  %v946_v8 = vrot.slane %v3865_v61, 5 }
  0x7e   :  { %v1888_v56 = vsel %vm4154_vm9, %v2991_v53, %v1887_v11  ;;  %v944_v61 = vsel %vm4004_vm6, %v2927_v51, %v943_v45  ;;  %v3563_v53 = vld [vmem:[#allocation2 + $0x80] ss:$12 sps:$4 sm:$0xff]   ;;  %v1331_v51 = vshll.u32 %v3991_v41, 16 }
  0x7f   :  { %3155 = vmatpush3.bf16.msra.mxu1 %v3558_v62 }
  0x80   :  { %3172 = vmatprep.subr.bf16.mxu1 %v4104_v38 }
  0x81   :  { %3141 = vmatmul.mubr.msk.bf16.gmra.mrb[36].mxu1 %vm345_vm2, %v3892_v24  ;;  %2947 = vmatmul.mubr.msk.bf16.gmra.mrb[8].mxu0 %vm345_vm2, %v4107_v42  ;;  %v940_v24 = vsel %vm4004_vm6, %v938_v4, %v939_v36  ;;  %v1891_v4 = vsel %vm4154_vm9, %v1889_v55, %v1890_v16  ;;  %v945_v36 = vrot.slane %v943_v45, 4  ;;  %v960_v45 = vrot.slane %v3935_v5, 5 }
  0x82   :  { %3144 = vmatprep.mubr.msk.bf16.mxu1 %vm345_vm2, %v3927_v1  ;;  %1120 = vmatprep.mubr.bf16.mxu0 %v3654_v0  ;;  %v4152_v1 = vor.u32 %v1498_v39, %v1497_v22  ;;  %v4161_v59 = vcombine.low %v937_v63, %v940_v24  ;;  %v4169_v22 = vcombine.low %v1888_v56, %v1891_v4  ;;  %v957_v63 = vrot.slane %v3912_v26, 5 }
  0x83   :  { %v4173_v39 = vcombine.low %v1895_v7, %v1898_v14  ;;  %v947_v11 = vsel %vm4004_vm6, %v945_v36, %v946_v8  ;;  %v2929_v24 = vrot.slane %v4211_v30, 9  ;;  %v964_v16 = vrot.slane %v3947_v18, 5 }
  0x84   :  { %v4192_v23 = vcombine.low %v944_v61, %v947_v11  ;;  %v1328_v14 = vshrl.u32 %v3991_v41, 16  ;;  %v967_v8 = vrot.slane %v3974_v12, 5  ;;  %v1333_v61 = vrot.slane %v1331_v51, 6 }
  0x85   :  { %v958_v17 = vsel %vm4004_vm6, %v2929_v24, %v957_v63  ;;  %v966_v36 = vrot.slane %v964_v16, 4  ;;  %v1342_v11 = vshrl.u32 %v4150_v27, 16 }
  0x86   :  { %v1330_v7 = vrot.slane %v1328_v14, 5  ;;  %v4285_v14 = vld [vmem:[%s4857_s0 + $0x20] sm:$0x3] }
  0x87   :  { %v968_v12 = vsel %vm4004_vm6, %v966_v36, %v967_v8  ;;  %v3564_v36 = vld [vmem:[#allocation2 + $0xc0] ss:$12 sps:$4 sm:$0xff]  }
  0x89   :  { %3145 = vmatmul.mubr.msk.bf16.gmra.mrb[40].mxu1 %vm345_vm2, %v3965_v52  ;;  %2948 = vmatmul.mubr.msk.bf16.gmra.mrb[12].mxu0 %vm345_vm2, %v4161_v59  ;;  %v4190_v52 = vld [vmem:[%s4857_s0 + $0x3c] sm:$0xe] }
  0x8a   :  { %3148 = vmatprep.mubr.msk.bf16.mxu1 %vm345_vm2, %v3998_v60  ;;  %1130 = vmatprep.mubr.bf16.mxu0 %v3654_v0  ;;  %v2928_v10 = vrot.slane %v4190_v52, 9  ;;  %v952_v60 = vrot.slane %v950_v43, 4 }
  0x8c   :  { %v951_v55 = vsel %vm4004_vm6, %v2928_v10, %v950_v43  ;;  %v954_v49 = vsel %vm4004_vm6, %v952_v60, %v953_v21  ;;  %v1345_v43 = vshll.u32 %v4150_v27, 16  ;;  %v1334_v27 = vor.u32 %v1333_v61, %v1330_v7 }
  0x8d   :  { %v1344_v10 = vrot.slane %v1342_v11, 5  ;;  %v1340_v21 = vrot.slane %v3755_v35, 4  ;;  %v1391_v61 = vshll.u32 %v4285_v14, 16  ;;  %v3571_v11 = vld [vmem:[#allocation2 + $0xdc] ss:$12 sps:$4 sm:$0xff]  }
  0x8e   :  { %v1347_v60 = vrot.slane %v1345_v43, 6 }
  0x90   :  { %v1348_v24 = vor.u32 %v1347_v60, %v1344_v10  ;;  %v1393_v10 = vrot.slane %v1391_v61, 6  ;;  %v3569_v60 = vld [vmem:[#allocation2 + $0xd8] ss:$12 sps:$4 sm:$0xff]  }
  0x91   :  { %3149 = vmatmul.mubr.msk.bf16.gmra.mrb[44].mxu1 %vm345_vm2, %v4036_v37  ;;  %2949 = vmatmul.mubr.msk.bf16.gmra.mrb[16].mxu0 %vm345_vm2, %v4192_v23  ;;  %v4213_v37 = vcombine.low %v951_v55, %v954_v49  ;;  %v1365_v49 = vshrl.u32 %v4118_v28, 16 }
  0x92   :  { %3156 = vmatprep.mubr.msk.bf16.mxu1 %vm345_vm2, %v3729_v13  ;;  %1140 = vmatprep.mubr.bf16.mxu0 %v3654_v0  ;;  %v959_v13 = vrot.slane %v957_v63, 4  ;;  %v1335_v63 = vrot.slane %v1334_v27, 4 }
  0x94   :  { %v961_v5 = vsel %vm4004_vm6, %v959_v13, %v960_v45 }
  0x95   :  { %v4239_v56 = vcombine.low %v958_v17, %v961_v5 }
  0x99   :  { %3157 = vmatmul.mubr.msk.bf16.vlgmr.msra.gmra.mrb[32].mxu1 %vm345_vm2, %v3771_v44  ;;  %2950 = vmatmul.mubr.msk.bf16.gmra.mrb[20].mxu0 %vm345_vm2, %v4213_v37  ;;  %v4232_v44 = vld [vmem:[%s4857_s0 + $0x54] sm:$0xe] }
  0x9a   :  { %3160 = vmatprep.mubr.msk.bf16.mxu1 %vm345_vm2, %v3820_v15  ;;  %1150 = vmatprep.mubr.bf16.mxu0 %v3654_v0  ;;  %v4237_v15 = vld [vmem:[#allocation2 + $0x98] ss:$12 sps:$4 sm:$0xff]   ;;  %v2930_v4 = vrot.slane %v4232_v44, 9 }
  0x9b   :  { %3173 = vmatpush3.bf16.msra.mxu1 %v4104_v38  ;;  %v1351_v38 = vshrl.u32 %v4031_v32, 16 }
  0x9c   :  { %3174 = vmatprep.subr.bf16.mxu1 %v3563_v53  ;;  %v965_v41 = vsel %vm4004_vm6, %v2930_v4, %v964_v16  ;;  %v1377_v16 = vshll.u32 %v4067_v19, 16 }
  0x9d   :  { %v4260_v55 = vcombine.low %v965_v41, %v968_v12  ;;  %v1353_v58 = vrot.slane %v1351_v38, 5  ;;  %v1397_v41 = vshrl.u32 %v4098_v34, 16  ;;  %v1400_v12 = vshll.u32 %v4098_v34, 16  ;;  %v4309_v34 = vld [vmem:[%s4857_s0 + $0x2c] sm:$0x3] }
  0x9e   :  { %v1379_v4 = vrot.slane %v1377_v16, 6 }
  0x9f   :  { %3175 = vmatpush3.bf16.msra.mxu1 %v3563_v53  ;;  %v1374_v53 = vshrl.u32 %v4067_v19, 16 }
  0xa0   :  { %3192 = vmatprep.subr.bf16.mxu1 %v4237_v15 }
  0xa1   :  { %3161 = vmatmul.mubr.msk.bf16.gmra.mrb[36].mxu1 %vm345_vm2, %v3855_v48  ;;  %2951 = vmatmul.mubr.msk.bf16.gmra.mrb[24].mxu0 %vm345_vm2, %v4239_v56  ;;  %v1354_v48 = vshll.u32 %v4031_v32, 16  ;;  %v1367_v32 = vrot.slane %v1365_v49, 5  ;;  %v1376_v51 = vrot.slane %v1374_v53, 5  ;;  %v1423_v53 = vshll.u32 %v4144_v46, 16 }
  0xa2   :  { %3164 = vmatprep.mubr.msk.bf16.mxu1 %vm345_vm2, %v3895_v25  ;;  %1160 = vmatprep.mubr.bf16.mxu0 %v3654_v0  ;;  %v1368_v25 = vshll.u32 %v4118_v28, 16  ;;  %v1339_v28 = vsel %vm4264_vm12, %v1335_v63, %v3755_v35  ;;  %v1388_v35 = vshrl.u32 %v4285_v14, 16  ;;  %v1411_v63 = vshrl.u32 %v4309_v34, 16 }
  0xa3   :  { %v1356_v13 = vrot.slane %v1354_v48, 6  ;;  %v1380_v43 = vor.u32 %v1379_v4, %v1376_v51  ;;  %v1409_v51 = vrot.slane %v4046_v57, 4 }
  0xa4   :  { %v1370_v5 = vrot.slane %v1368_v25, 6 }
  0xa5   :  { %v1357_v17 = vor.u32 %v1356_v13, %v1353_v58  ;;  %v1381_v48 = vrot.slane %v1380_v43, 4  ;;  %v1402_v58 = vrot.slane %v1400_v12, 6  ;;  %v3568_v13 = vld [vmem:[#allocation2 + $0xb0] ss:$12 sps:$4 sm:$0xff]  }
  0xa6   :  { %v1371_v7 = vor.u32 %v1370_v5, %v1367_v32  ;;  %v1420_v32 = vshrl.u32 %v4144_v46, 16  ;;  %v4334_v46 = vld [vmem:[%s4857_s0 + $0x38] sm:$0x3] }
  0xa7   :  { %v1358_v8 = vrot.slane %v1357_v17, 4  ;;  %v1385_v16 = vsel %vm4264_vm12, %v1381_v48, %v4034_v33  ;;  %v1466_v48 = vshrl.u32 %v4211_v30, 16 }
  0xa9   :  { %3165 = vmatmul.mubr.msk.bf16.gmra.mrb[40].mxu1 %vm345_vm2, %v3930_v54  ;;  %2952 = vmatmul.mubr.msk.bf16.gmra.mrb[28].mxu0 %vm345_vm2, %v4260_v55  ;;  %v1349_v54 = vsel %vm4264_vm12, %v1340_v21, %v1348_v24  ;;  %v1362_v38 = vsel %vm4264_vm12, %v1358_v8, %v4008_v40  ;;  %v1399_v21 = vrot.slane %v1397_v41, 5  ;;  %v1414_v24 = vshll.u32 %v4309_v34, 16  ;;  %v4361_v41 = vld [vmem:[%s4857_s0 + $0x44] sm:$0x3] }
  0xaa   :  { %3168 = vmatprep.mubr.msk.bf16.mxu1 %vm345_vm2, %v3963_v47  ;;  %1632 = vmatprep.mubr.bf16.mxu0 %v3654_v0  ;;  %v4287_v19 = vcombine.low %v1339_v28, %v1349_v54  ;;  %v1363_v47 = vrot.slane %v4008_v40, 4  ;;  %v1386_v40 = vrot.slane %v4034_v33, 4  ;;  %v1413_v28 = vrot.slane %v1411_v63, 5  ;;  %v4385_v63 = vld [vmem:[%s4857_s0 + $0x50] sm:$0x3] }
  0xab   :  { %v1403_v25 = vor.u32 %v1402_v58, %v1399_v21  ;;  %v1416_v54 = vrot.slane %v1414_v24, 6  ;;  %v1425_v33 = vrot.slane %v1423_v53, 6  ;;  %v1469_v21 = vshll.u32 %v4211_v30, 16 }
  0xac   :  { %v1372_v27 = vsel %vm4264_vm12, %v1363_v47, %v1371_v7  ;;  %v1422_v47 = vrot.slane %v1420_v32, 5  ;;  %v1443_v7 = vshrl.u32 %v4190_v52, 16  ;;  %v1480_v53 = vshrl.u32 %v4385_v63, 16 }
  0xad   :  { %v1404_v5 = vrot.slane %v1403_v25, 4  ;;  %v1417_v4 = vor.u32 %v1416_v54, %v1413_v28  ;;  %v1455_v25 = vrot.slane %v4083_v29, 4  ;;  %v1489_v28 = vshrl.u32 %v4232_v44, 16 }
  0xae   :  { %v1426_v8 = vor.u32 %v1425_v33, %v1422_v47  ;;  %v4406_v33 = vld [vmem:[%s4857_s0 + $0x5c] sm:$0x3] }
  0xaf   :  { %v1408_v61 = vsel %vm4264_vm12, %v1404_v5, %v4046_v57  ;;  %v1457_v57 = vshrl.u32 %v4361_v41, 16  ;;  %v1482_v5 = vrot.slane %v1480_v53, 5  ;;  %v1929_v53 = vrot.slane %v3912_v26, 6 }
  0xb0   :  { %v1427_v12 = vrot.slane %v1426_v8, 4  ;;  %v1503_v8 = vshrl.u32 %v4406_v33, 16 }
  0xb1   :  { %3169 = vmatmul.mubr.msk.bf16.gmra.mrb[44].mxu1 %vm345_vm2, %v4001_v3  ;;  %2975 = vmatmul.mubr.msk.bf16.vlgmr.msra.gmra.mrb[0].mxu0 %vm345_vm2, %v4287_v19  ;;  %v1390_v3 = vrot.slane %v1388_v35, 5  ;;  %v1446_v35 = vshll.u32 %v4190_v52, 16 }
  0xb2   :  { %3176 = vmatprep.mubr.msk.bf16.mxu1 %vm345_vm2, %v4038_v6  ;;  %2031 = vmatpush1.bf16.msra.mxu0 %v3564_v36  ;;  %v4311_v6 = vcombine.low %v1362_v38, %v1372_v27  ;;  %v1434_v36 = vshrl.u32 %v4334_v46, 16  ;;  %v1432_v27 = vrot.slane %v4069_v50, 4  ;;  %v1431_v58 = vsel %vm4264_vm12, %v1427_v12, %v4069_v50 }
  0xb3   :  { %1642 = vmatprep.mubr.bf16.mxu0 %v3654_v0  ;;  %2032 = vmatprep.subr.bf16.mxu0 %v3571_v11  ;;  %v1394_v49 = vor.u32 %v1393_v10, %v1390_v3  ;;  %v1448_v38 = vrot.slane %v1446_v35, 6  ;;  %v1460_v10 = vshll.u32 %v4361_v41, 16  ;;  %v1483_v50 = vshll.u32 %v4385_v63, 16  ;;  %v3573_v35 = vld [vmem:[#allocation2 + $0xe0] ss:$12 sps:$4 sm:$0xff]  }
  0xb4   :  { %v1436_v11 = vrot.slane %v1434_v36, 5  ;;  %v1491_v36 = vrot.slane %v1489_v28, 5 }
  0xb5   :  { %v1485_v47 = vrot.slane %v1483_v50, 6  ;;  %v1864_v50 = vld [vmem:[%s4857_s0 + $0x48] sm:$0xc] }
  0xb6   :  { %2033 = vmatpush1.bf16.msra.mxu0 %v3569_v60 }
  0xb9   :  { %3177 = vmatmul.mubr.msk.bf16.vlgmr.msra.gmra.mrb[32].mxu1 %vm345_vm2, %v4071_v20  ;;  %2976 = vmatmul.mubr.msk.bf16.gmra.mrb[4].mxu0 %vm345_vm2, %v4311_v6  ;;  %v1395_v20 = vsel %vm4264_vm12, %v1386_v40, %v1394_v49  ;;  %v1459_v40 = vrot.slane %v1457_v57, 5  ;;  %v1462_v49 = vrot.slane %v1460_v10, 6  ;;  %v1904_v57 = vrot.slane %v4285_v14, 6  ;;  %v3575_v10 = vld [vmem:[%s4857_s0 + $0x28] sm:$0xf] }
  0xba   :  { %3180 = vmatprep.mubr.msk.bf16.mxu1 %vm345_vm2, %v4107_v42  ;;  %1652 = vmatprep.mubr.bf16.mxu0 %v3654_v0  ;;  %v4336_v42 = vld [vmem:[#allocation2 + $0xc8] ss:$12 sps:$4 sm:$0xff]   ;;  %v4338_v17 = vcombine.low %v1385_v16, %v1395_v20 }
  0xbb   :  { %3193 = vmatpush3.bf16.msra.mxu1 %v4237_v15  ;;  %v1437_v15 = vshll.u32 %v4334_v46, 16  ;;  %v1463_v32 = vor.u32 %v1462_v49, %v1459_v40 }
  0xbc   :  { %3194 = vmatprep.subr.bf16.mxu1 %v3568_v13 }
  0xbd   :  { %v1439_v43 = vrot.slane %v1437_v15, 6  ;;  %v1464_v54 = vsel %vm4264_vm12, %v1455_v25, %v1463_v32 }
  0xbf   :  { %3195 = vmatpush3.bf16.msra.mxu1 %v3568_v13  ;;  %v1440_v3 = vor.u32 %v1439_v43, %v1436_v11  ;;  %v1468_v13 = vrot.slane %v1466_v48, 5  ;;  %v1505_v11 = vrot.slane %v1503_v8, 5 }
  0xc0   :  { %3212 = vmatprep.subr.bf16.mxu1 %v4336_v42 }
  0xc1   :  { %3181 = vmatmul.mubr.msk.bf16.gmra.mrb[36].mxu1 %vm345_vm2, %v4161_v59  ;;  %2977 = vmatmul.mubr.msk.bf16.gmra.mrb[8].mxu0 %vm345_vm2, %v4338_v17  ;;  %v1418_v59 = vsel %vm4264_vm12, %v1409_v51, %v1417_v4  ;;  %v1478_v4 = vrot.slane %v4109_v9, 4 }
  0xc2   :  { %3184 = vmatprep.mubr.msk.bf16.mxu1 %vm345_vm2, %v4192_v23  ;;  %1662 = vmatprep.mubr.bf16.mxu0 %v3654_v0  ;;  %v4363_v52 = vcombine.low %v1408_v61, %v1418_v59  ;;  %v1445_v23 = vrot.slane %v1443_v7, 5  ;;  %v1506_v7 = vshll.u32 %v4406_v33, 16 }
  0xc4   :  { %v1449_v60 = vor.u32 %v1448_v38, %v1445_v23  ;;  %v1508_v43 = vrot.slane %v1506_v7, 6  ;;  %v1501_v23 = vrot.slane %v4152_v1, 4  ;;  %v1939_v7 = vrot.slane %v4406_v33, 6 }
  0xc6   :  { %v1450_v24 = vrot.slane %v1449_v60, 4  ;;  %v1509_v38 = vor.u32 %v1508_v43, %v1505_v11  ;;  %v1908_v60 = vrot.slane %v3575_v10, 6 }
  0xc8   :  { %v1454_v16 = vsel %vm4264_vm12, %v1450_v24, %v4083_v29  ;;  %v1910_v49 = vrot.slane %v1908_v60, 4 }
  0xc9   :  { %3185 = vmatmul.mubr.msk.bf16.gmra.mrb[40].mxu1 %vm345_vm2, %v4213_v37  ;;  %2978 = vmatmul.mubr.msk.bf16.gmra.mrb[12].mxu0 %vm345_vm2, %v4363_v52  ;;  %v1441_v37 = vsel %vm4264_vm12, %v1432_v27, %v1440_v3  ;;  %v2966_v29 = vcombine.low %v1454_v16, %v1464_v54  ;;  %v1925_v54 = vrot.slane %v4361_v41, 6  ;;  %v1936_v41 = vrot.slane %v3947_v18, 6 }
  0xca   :  { %3188 = vmatprep.mubr.msk.bf16.mxu1 %vm345_vm2, %v4239_v56  ;;  %1672 = vmatprep.mubr.bf16.mxu0 %v3654_v0  ;;  %v2965_v30 = vcombine.low %v1431_v58, %v1441_v37  ;;  %v1471_v56 = vrot.slane %v1469_v21, 6  ;;  %v1861_v21 = vld [vmem:[%s4857_s0 + $0x24] sm:$0xc]  ;;  %v1915_v58 = vrot.slane %v3839_v31, 6 }
  0xcb   :  { %v2994_v40 = vrot.slane %v1861_v21, 10  ;;  %v1938_v8 = vrot.slane %v1936_v41, 4 }
  0xcc   :  { %v1472_v20 = vor.u32 %v1471_v56, %v1468_v13  ;;  %v1917_v13 = vrot.slane %v1915_v58, 4  ;;  %v1918_v56 = vrot.slane %v4334_v46, 6 }
  0xcd   :  { %v1909_v31 = vsel %vm4154_vm9, %v2994_v40, %v1908_v60 }
  0xce   :  { %v1473_v51 = vrot.slane %v1472_v20, 4  ;;  %v1919_v32 = vsel %vm4154_vm9, %v1917_v13, %v1918_v56  ;;  %v2591_v13 = vld [vmem:[#allocation5 + $0x80] sm:$0xff]  ;;  %v2592_v56 = vld [vmem:[#allocation5 + $0x88] sm:$0xff] }
  0xd1   :  { %3189 = vmatmul.mubr.msk.bf16.gmra.mrb[44].mxu1 %vm345_vm2, %v4260_v55  ;;  %2979 = vmatmul.mubr.msk.bf16.gmra.mrb[16].mxu0 %vm345_vm2, %v2965_v30  ;;  %v1492_v55 = vshll.u32 %v4232_v44, 16  ;;  %v1477_v44 = vsel %vm4264_vm12, %v1473_v51, %v4109_v9 }
  0xd2   :  { %3196 = vmatprep.mubr.msk.bf16.mxu1 %vm345_vm2, %v4287_v19  ;;  %1682 = vmatprep.mubr.bf16.mxu0 %v3654_v0  ;;  %v1486_v19 = vor.u32 %v1485_v47, %v1482_v5  ;;  %v2997_v5 = vrot.slane %v1864_v50, 10  ;;  %v1931_v47 = vrot.slane %v1929_v53, 4  ;;  %v2577_v50 = vld [vmem:[#allocation5 + $0x10] sm:$0xff] }
  0xd3   :  { %v1494_v15 = vrot.slane %v1492_v55, 6  ;;  %v1932_v55 = vrot.slane %v4385_v63, 6 }
  0xd4   :  { %v1487_v61 = vsel %vm4264_vm12, %v1478_v4, %v1486_v19  ;;  %v1930_v51 = vsel %vm4154_vm9, %v2997_v5, %v1929_v53  ;;  %v1865_v4 = vld [vmem:[%s4857_s0 + $0x54] sm:$0xc] }
  0xd5   :  { %v1495_v59 = vor.u32 %v1494_v15, %v1491_v36  ;;  %v1933_v63 = vsel %vm4154_vm9, %v1931_v47, %v1932_v55  ;;  %v2998_v15 = vrot.slane %v1865_v4, 10  ;;  %v2579_v5 = vld [vmem:[#allocation5 + $0x20] sm:$0xff]  ;;  %v2580_v47 = vld [vmem:[#allocation5 + $0x28] sm:$0xff] }
  0xd6   :  { %v3005_v19 = vcombine.low %v1930_v51, %v1933_v63  ;;  %v3277_v55 = vpack.c.bf16 %v2580_v47, %v2579_v5  ;;  %v2581_v51 = vld [vmem:[#allocation5 + $0x30] sm:$0xff]  ;;  %v2582_v63 = vld [vmem:[#allocation5 + $0x38] sm:$0xff]  ;;  %v4867_v47 = vmov 0.0|0.0  }
  0xd7   :  { %v1496_v12 = vrot.slane %v1495_v59, 4  ;;  %v1937_v18 = vsel %vm4154_vm9, %v2998_v15, %v1936_v41  ;;  %v3281_v4 = vpack.c.bf16 %v2582_v63, %v2581_v51  ;;  %v2583_v15 = vld [vmem:[#allocation5 + $0x40] sm:$0xff]  ;;  %v4593_v51 = vld [vmem:[%s4859_s2] sm:$0xff] }
  0xd9   :  { %3197 = vmatmul.mubr.msk.bf16.vlgmr.msra.gmra.mrb[32].mxu1 %vm345_vm2, %v4311_v6  ;;  %2980 = vmatmul.mubr.msk.bf16.gmra.mrb[20].mxu0 %vm345_vm2, %v2966_v29  ;;  %v2967_v6 = vcombine.low %v1477_v44, %v1487_v61  ;;  %v1500_v9 = vsel %vm4264_vm12, %v1496_v12, %v4152_v1  ;;  %v1860_v1 = vld [vmem:[%s4857_s0 + $0x18] sm:$0xc] }
  0xda   :  { %3200 = vmatprep.mubr.msk.bf16.mxu1 %vm345_vm2, %v4338_v17  ;;  %1692 = vmatprep.mubr.bf16.mxu0 %v3654_v0  ;;  %v2993_v45 = vrot.slane %v1860_v1, 10 }
  0xdb   :  { %3213 = vmatpush3.bf16.msra.mxu1 %v4336_v42  ;;  %v1510_v42 = vsel %vm4264_vm12, %v1501_v23, %v1509_v38 }
  0xdc   :  { %3214 = vmatprep.subr.bf16.mxu1 %v3573_v35  ;;  %v2968_v17 = vcombine.low %v1500_v9, %v1510_v42 }
  0xdf   :  { %3215 = vmatpush3.bf16.msra.mxu1 %v3573_v35  ;;  %v1940_v35 = vsel %vm4154_vm9, %v1938_v8, %v1939_v7  ;;  %v2584_v7 = vld [vmem:[#allocation5 + $0x48] sm:$0xff] }
  0xe0   :  { %v3006_v61 = vcombine.low %v1937_v18, %v1940_v35  ;;  %v2601_v18 = vld [vmem:[#allocation5 + $0xd0] sm:$0xff]  ;;  %v2602_v35 = vld [vmem:[#allocation5 + $0xd8] sm:$0xff] }
  0xe1   :  { %3201 = vmatmul.mubr.msk.bf16.gmra.mrb[36].mxu1 %vm345_vm2, %v4363_v52  ;;  %2981 = vmatmul.mubr.msk.bf16.gmra.mrb[24].mxu0 %vm345_vm2, %v2967_v6  ;;  %v3574_v52 = vld [vmem:[%s4857_s0 + $0x1c] sm:$0xf] }
  0xe2   :  { %3204 = vmatprep.mubr.msk.bf16.mxu1 %vm345_vm2, %v2965_v30  ;;  %1702 = vmatprep.mubr.bf16.mxu0 %v3654_v0  ;;  %v1901_v27 = vrot.slane %v3574_v52, 6  ;;  %v1911_v30 = vrot.slane %v4309_v34, 6  ;;  %v1922_v34 = vrot.slane %v3874_v2, 6 }
  0xe4   :  { %v1903_v3 = vrot.slane %v1901_v27, 4  ;;  %v1902_v48 = vsel %vm4154_vm9, %v2993_v45, %v1901_v27  ;;  %v1912_v25 = vsel %vm4154_vm9, %v1910_v49, %v1911_v30  ;;  %v1924_v2 = vrot.slane %v1922_v34, 4 }
  0xe5   :  { %v3002_v16 = vcombine.low %v1909_v31, %v1912_v25  ;;  %v3267_v31 = vpack.c.bf16 %v2592_v56, %v2591_v13  ;;  %v2575_v25 = vld [vmem:[#allocation5] sm:$0xff]  ;;  %v3287_v13 = vpack.c.bf16 %v2602_v35, %v2601_v18  ;;  %v2585_v56 = vld [vmem:[#allocation5 + $0x50] sm:$0xff] }
  0xe6   :  { %v1905_v14 = vsel %vm4154_vm9, %v1903_v3, %v1904_v57 }
  0xe7   :  { %v3001_v37 = vcombine.low %v1902_v48, %v1905_v14  ;;  %3268 = vmatprep.subr.bf16.mxu1 %v3267_v31  ;;  %v2586_v31 = vld [vmem:[#allocation5 + $0x58] sm:$0xff] }
  0xe9   :  { %3205 = vmatmul.mubr.msk.bf16.gmra.mrb[40].mxu1 %vm345_vm2, %v2966_v29  ;;  %2982 = vmatmul.mubr.msk.bf16.gmra.mrb[28].mxu0 %vm345_vm2, %v2968_v17  ;;  %v1926_v29 = vsel %vm4154_vm9, %v1924_v2, %v1925_v54  ;;  %v2596_v2 = vld [vmem:[#allocation5 + $0xa8] sm:$0xff] }
  0xea   :  { %3208 = vmatprep.mubr.msk.bf16.mxu1 %vm345_vm2, %v2967_v6  ;;  %2062 = vmatprep.mubr.bf16.mxu0 %v3654_v0 }
  0xf1   :  { %3209 = vmatmul.mubr.msk.bf16.gmra.mrb[44].mxu1 %vm345_vm2, %v2968_v17  ;;  %3013 = vmatmul.mubr.msk.bf16.vlgmr.msra.gmra.mrb[0].mxu0 %vm345_vm2, %v4169_v22 }
  0xf2   :  { %3216 = vmatprep.mubr.msk.bf16.mxu1 %vm345_vm2, %v4169_v22  ;;  %2072 = vmatprep.mubr.bf16.mxu0 %v3654_v0  ;;  %v1862_v22 = vld [vmem:[%s4857_s0 + $0x30] sm:$0xc] }
  0xf3   :  { %v2995_v24 = vrot.slane %v1862_v22, 10 }
  0xf5   :  { %v1916_v46 = vsel %vm4154_vm9, %v2995_v24, %v1915_v58 }
  0xf6   :  { %v3003_v20 = vcombine.low %v1916_v46, %v1919_v32  ;;  %v2593_v32 = vld [vmem:[#allocation5 + $0x90] sm:$0xff] }
  0xf9   :  { %3217 = vmatmul.mubr.msk.bf16.vlgmr.msra.gmra.mrb[32].mxu1 %vm345_vm2, %v4173_v39  ;;  %3014 = vmatmul.mubr.msk.bf16.gmra.mrb[4].mxu0 %vm345_vm2, %v4173_v39  ;;  %v1863_v39 = vld [vmem:[%s4857_s0 + $0x3c] sm:$0xc] }
  0xfa   :  { %3220 = vmatprep.mubr.msk.bf16.mxu1 %vm345_vm2, %v3001_v37  ;;  %2082 = vmatprep.mubr.bf16.mxu0 %v3654_v0  ;;  %v2996_v28 = vrot.slane %v1863_v39, 10  ;;  %v2594_v39 = vld [vmem:[#allocation5 + $0x98] sm:$0xff] }
  0xfb   :  { %v3271_v53 = vpack.c.bf16 %v2594_v39, %v2593_v32  ;;  %v2587_v39 = vld [vmem:[#allocation5 + $0x60] sm:$0xff] }
  0xfc   :  { %v1923_v26 = vsel %vm4154_vm9, %v2996_v28, %v1922_v34  ;;  %v2576_v34 = vld [vmem:[#allocation5 + $0x8] sm:$0xff]  ;;  %v2595_v28 = vld [vmem:[#allocation5 + $0xa0] sm:$0xff] }
  0xfd   :  { %v3004_v36 = vcombine.low %v1923_v26, %v1926_v29  ;;  %v3269_v46 = vpack.c.bf16 %v2576_v34, %v2575_v25  ;;  %v3275_v54 = vpack.c.bf16 %v2596_v2, %v2595_v28  ;;  %v2597_v26 = vld [vmem:[#allocation5 + $0xb0] sm:$0xff]  ;;  %v2598_v29 = vld [vmem:[#allocation5 + $0xb8] sm:$0xff]  ;;  %v2603_v25 = vld [vmem:[#allocation5 + $0xe0] sm:$0xff] }
  0xfe   :  { %v3279_v41 = vpack.c.bf16 %v2598_v29, %v2597_v26  ;;  %v2604_v34 = vld [vmem:[#allocation5 + $0xe8] sm:$0xff]  ;;  %v2589_v2 = vld [vmem:[#allocation5 + $0x70] sm:$0xff] }
  0xff   :  { %3270 = vmatpush3.bf16.msra.mxu1 %v3269_v46  ;;  %v3289_v46 = vpack.c.bf16 %v2586_v31, %v2585_v56  ;;  %v3291_v32 = vpack.c.bf16 %v2604_v34, %v2603_v25  ;;  %v4623_v34 = vld [vmem:[%s4859_s2 + $0x10] sm:$0xff] }
 0x100   :  { %3272 = vmatprep.subr.bf16.mxu1 %v3271_v53  ;;  %v2588_v53 = vld [vmem:[#allocation5 + $0x68] sm:$0xff] }
 0x101   :  { %3221 = vmatmul.mubr.msk.bf16.gmra.mrb[36].mxu1 %vm345_vm2, %v3002_v16  ;;  %3015 = vmatmul.mubr.msk.bf16.gmra.mrb[8].mxu0 %vm345_vm2, %v3001_v37 }
 0x102   :  { %3224 = vmatprep.mubr.msk.bf16.mxu1 %vm345_vm2, %v3003_v20  ;;  %2092 = vmatprep.mubr.bf16.mxu0 %v3654_v0 }
 0x109   :  { %3225 = vmatmul.mubr.msk.bf16.gmra.mrb[40].mxu1 %vm345_vm2, %v3004_v36  ;;  %3016 = vmatmul.mubr.msk.bf16.gmra.mrb[12].mxu0 %vm345_vm2, %v3002_v16  ;;  %v2578_v16 = vld [vmem:[#allocation5 + $0x18] sm:$0xff] }
 0x10a   :  { %3228 = vmatprep.mubr.msk.bf16.mxu1 %vm345_vm2, %v3005_v19  ;;  %2102 = vmatprep.mubr.bf16.mxu0 %v3654_v0 }
 0x10c   :  { %v4516_v44 = vpop.f32.mrb[0].mxu1 }
 0x10d   :  { %v4518_v59 = vpop.f32.mrb[1].mxu1 }
 0x10e   :  { %v4520_v33 = vpop.f32.mrb[2].mxu1 }
 0x10f   :  { %v4522_v11 = vpop.f32.mrb[3].mxu1 }
 0x111   :  { %3229 = vmatmul.mubr.msk.bf16.gmra.mrb[44].mxu1 %vm345_vm2, %v3006_v61  ;;  %3017 = vmatmul.mubr.msk.bf16.gmra.mrb[16].mxu0 %vm345_vm2, %v3003_v20  ;;  %v3273_v20 = vpack.c.bf16 %v2578_v16, %v2577_v50  ;;  %v2605_v50 = vld [vmem:[#allocation5 + $0xf0] sm:$0xff]  ;;  %v2606_v16 = vld [vmem:[#allocation5 + $0xf8] sm:$0xff] }
 0x112   :  { %2112 = vmatprep.mubr.bf16.mxu0 %v3654_v0  ;;  %v3295_v28 = vpack.c.bf16 %v2606_v16, %v2605_v50 }
 0x113   :  { %3274 = vmatpush3.bf16.msra.mxu1 %v3273_v20  ;;  %v3293_v20 = vpack.c.bf16 %v2588_v53, %v2587_v39 }
 0x114   :  { %v4527_v43 = vpop.f32.mrb[4].mxu1  ;;  %3276 = vmatprep.subr.bf16.mxu1 %v3275_v54  ;;  %v2590_v54 = vld [vmem:[#allocation5 + $0x78] sm:$0xff] }
 0x115   :  { %v4529_v62 = vpop.f32.mrb[5].mxu1  ;;  %v3297_v5 = vpack.c.bf16 %v2590_v54, %v2589_v2 }
 0x116   :  { %v4531_v6 = vpop.f32.mrb[6].mxu1 }
 0x117   :  { %v4533_v12 = vpop.f32.mrb[7].mxu1  ;;  %3278 = vmatpush3.bf16.msra.mxu1 %v3277_v55  ;;  %v2512_v55 = vlaneseq }
 0x118   :  { %3280 = vmatprep.subr.bf16.mxu1 %v3279_v41 }
 0x119   :  { %3018 = vmatmul.mubr.msk.bf16.gmra.mrb[20].mxu0 %vm345_vm2, %v3004_v36  ;;  %v2599_v36 = vld [vmem:[#allocation5 + $0xc0] sm:$0xff] }
 0x11a   :  { %2122 = vmatprep.mubr.bf16.mxu0 %v3654_v0 }
 0x11b   :  { %3282 = vmatpush3.bf16.msra.mxu1 %v3281_v4 }
 0x11c   :  { %v4537_v23 = vpop.f32.mrb[8].mxu1 }
 0x11d   :  { %v4539_v38 = vpop.f32.mrb[9].mxu1 }
 0x11e   :  { %v4541_v9 = vpop.f32.mrb[10].mxu1 }
 0x11f   :  { %v4543_v42 = vpop.f32.mrb[11].mxu1 }
 0x121   :  { %3019 = vmatmul.mubr.msk.bf16.gmra.mrb[24].mxu0 %vm345_vm2, %v3005_v19  ;;  %v2600_v19 = vld [vmem:[#allocation5 + $0xc8] sm:$0xff] }
 0x122   :  { %2132 = vmatprep.mubr.bf16.mxu0 %v3654_v0  ;;  %v3283_v8 = vpack.c.bf16 %v2600_v19, %v2599_v36  ;;  %v4599_v36 = vld [vmem:[%s4859_s2 + $0x18] sm:$0xff]  ;;  %v2513_v19 = vshrl.u32 %v2512_v55, 7 }
 0x124   :  { %v4547_v17 = vpop.f32.mrb[12].mxu1  ;;  %3284 = vmatprep.subr.bf16.mxu1 %v3283_v8  ;;  %v2518_v50 = vsub.s32 1, %v2513_v19 }
 0x125   :  { %v4549_v52 = vpop.f32.mrb[13].mxu1 }
 0x126   :  { %v4551_v27 = vpop.f32.mrb[14].mxu1 }
 0x127   :  { %v4553_v1 = vpop.f32.mrb[15].mxu1 }
 0x129   :  { %3020 = vmatmul.mubr.msk.bf16.gmra.mrb[28].mxu0 %vm345_vm2, %v3006_v61  ;;  %v3285_v61 = vpack.c.bf16 %v2584_v7, %v2583_v15  ;;  %v4604_v15 = vld [vmem:[%s4859_s2 + $0x8] sm:$0xff]  ;;  %v4610_v7 = vld [vmem:[%s4859_s2 + $0x20] sm:$0xff]  ;;  %vm2670_vm2 = vcmask 1046534  }
 0x12b   :  { %3286 = vmatpush3.bf16.msra.mxu1 %v3285_v61 }
 0x12c   :  { %v4556_v45 = vpop.f32.mrb[16].mxu1  ;;  %3288 = vmatprep.subr.bf16.mxu1 %v3287_v13  ;;  %v2514_v13 = vsub.s32 0, %v2513_v19 }
 0x12d   :  { %v4558_v3 = vpop.f32.mrb[17].mxu1 }
 0x12e   :  { %v4560_v57 = vpop.f32.mrb[18].mxu1 }
 0x12f   :  { %v4562_v10 = vpop.f32.mrb[19].mxu1  ;;  %3290 = vmatpush3.bf16.msra.mxu1 %v3289_v46  ;;  %v4628_v46 = vld [vmem:[%s4859_s2 + $0x28] sm:$0xff] }
 0x130   :  { %3292 = vmatprep.subr.bf16.mxu1 %v3291_v32 }
 0x133   :  { %3294 = vmatpush3.bf16.msra.mxu1 %v3293_v20 }
 0x134   :  { %v4564_v60 = vpop.f32.mrb[20].mxu1  ;;  %3296 = vmatprep.subr.bf16.mxu1 %v3295_v28 }
 0x135   :  { %v4566_v0 = vpop.f32.mrb[21].mxu1 }
 0x136   :  { %v4568_v48 = vpop.f32.mrb[22].mxu1 }
 0x137   :  { %v4570_v14 = vpop.f32.mrb[23].mxu1  ;;  %3298 = vmatpush3.bf16.msra.mxu1 %v3297_v5  ;;  %v2522_v5 = vsub.s32 2, %v2513_v19 }
 0x138   :  { %3299 = vmatprep.subr.bf16.mxu1 %v4867_v47 }
 0x13c   :  { %v4572_v21 = vpop.f32.mrb[24].mxu1 }
 0x13d   :  { %v4574_v58 = vpop.f32.mrb[25].mxu1 }
 0x13e   :  { %v4576_v22 = vpop.f32.mrb[26].mxu1 }
 0x13f   :  { %v4578_v37 = vpop.f32.mrb[27].mxu1 }
 0x144   :  { %v4580_v40 = vpop.f32.mrb[28].mxu1 }
 0x145   :  { %v4582_v49 = vpop.f32.mrb[29].mxu1 }
 0x146   :  { %4881 = vst [vmem:[#allocation11_spill] sm:$0xff] %v4582_v49  ;;  %v4584_v30 = vpop.f32.mrb[30].mxu1 }
 0x147   :  { %4882 = vst [vmem:[#allocation12_spill] sm:$0xff] %v4584_v30  ;;  %v4586_v24 = vpop.f32.mrb[31].mxu1 }
 0x148   :  { %4883 = vst [vmem:[#allocation13_spill] sm:$0xff] %v4586_v24 }
 0x1c4   :  { %v2064_v26 = vpop.f32.mrb[0].mxu0 }
 0x1c5   :  { %v3323_v29 = vadd.f32 %v2064_v26, %v4516_v44  ;;  %v2066_v41 = vpop.f32.mrb[1].mxu0 }
 0x1c6   :  { %v3324_v63 = vadd.f32 %v2066_v41, %v4518_v59  ;;  %v2068_v4 = vpop.f32.mrb[2].mxu0 }
 0x1c7   :  { %v3325_v44 = vadd.f32 %v2068_v4, %v4520_v33  ;;  %v2070_v8 = vpop.f32.mrb[3].mxu0  ;;  %v2294_v18 = vadd.f32 %v3323_v29, %v4593_v51  ;;  %v2510_v33 = vld [vmem:[%s4860_s3] sm:$0x7] }
 0x1c8   :  { %v3326_v59 = vadd.f32 %v2070_v8, %v4522_v11  ;;  %v2295_v61 = vadd.f32 %v3324_v63, %v4604_v15  ;;  %v4631_v28 = vrot.slane %v2510_v33, %v2514_v13 }
 0x1c9   :  { %v2297_v35 = vadd.f32 %v3325_v44, %v4599_v36 }
 0x1ca   :  { %v2298_v56 = vadd.f32 %v3326_v59, %v4610_v7 }
 0x1cb   :  { %v2342_v31 = vmax.f32 %v2294_v18, %v2297_v35 }
 0x1cc   :  { %v3218_v25 = vpop.f32.mrb[32].mxu1  ;;  %v2349_v11 = vmax.f32 %v2295_v61, %v2298_v56  ;;  %v2074_v32 = vpop.f32.mrb[4].mxu0 }
 0x1cd   :  { %v2343_v39 = vrot.slane %v2342_v31, 4  ;;  %v2177_v53 = vpop.f32.mrb[33].mxu1  ;;  %v3327_v16 = vadd.f32 %v2074_v32, %v4527_v43  ;;  %v2076_v20 = vpop.f32.mrb[5].mxu0  ;;  %v2302_v29 = vadd.f32 %v3218_v25, %v4623_v34 }
 0x1ce   :  { %v2350_v2 = vrot.slane %v2349_v11, 4  ;;  %v3219_v54 = vpop.f32.mrb[34].mxu1  ;;  %v3328_v55 = vadd.f32 %v2076_v20, %v4529_v62  ;;  %v2078_v26 = vpop.f32.mrb[6].mxu0  ;;  %v2296_v43 = vadd.f32 %v4623_v34, %v2177_v53 }
 0x1cf   :  { %v2344_v41 = vmax.f32 %v2342_v31, %v2343_v39  ;;  %v2305_v63 = vadd.f32 %v3219_v54, %v4628_v46  ;;  %v2180_v4 = vpop.f32.mrb[35].mxu1  ;;  %v3329_v44 = vadd.f32 %v2078_v26, %v4531_v6  ;;  %v2080_v8 = vpop.f32.mrb[7].mxu0  ;;  %v2300_v62 = vadd.f32 %v3327_v16, %v4593_v51 }
 0x1d0   :  { %v2351_v59 = vmax.f32 %v2349_v11, %v2350_v2  ;;  %v2299_v18 = vadd.f32 %v4628_v46, %v2180_v4  ;;  %v3330_v35 = vadd.f32 %v2080_v8, %v4533_v12  ;;  %v2301_v25 = vadd.f32 %v3328_v55, %v4604_v15 }
 0x1d1   :  { %v2345_v19 = vrot.slane %v2344_v41, 2  ;;  %v2377_v61 = vmax.f32 %v2302_v29, %v2305_v63  ;;  %v2303_v13 = vadd.f32 %v3329_v44, %v4599_v36  ;;  %v4644_v39 = vrot.slane %v2510_v33, %v2518_v50 }
 0x1d2   :  { %v2352_v56 = vrot.slane %v2351_v59, 2  ;;  %v2356_v31 = vmax.f32 %v2296_v43, %v2299_v18  ;;  %v2304_v6 = vadd.f32 %v3330_v35, %v4610_v7  ;;  %v4646_v2 = vrot.slane %v2510_v33, %v2522_v5 }
 0x1d3   :  { %v2346_v32 = vmax.f32 %v2344_v41, %v2345_v19  ;;  %v2378_v11 = vrot.slane %v2377_v61, 4  ;;  %v2363_v53 = vmax.f32 %v2300_v62, %v2303_v13 }
 0x1d4   :  { %v2353_v20 = vmax.f32 %v2351_v59, %v2352_v56  ;;  %v2357_v12 = vrot.slane %v2356_v31, 4  ;;  %v3222_v54 = vpop.f32.mrb[36].mxu1  ;;  %v2370_v26 = vmax.f32 %v2301_v25, %v2304_v6  ;;  %v2084_v16 = vpop.f32.mrb[8].mxu0 }
 0x1d5   :  { %v2347_v29 = vrot.slane %v2346_v32, 1  ;;  %v2379_v63 = vmax.f32 %v2377_v61, %v2378_v11  ;;  %v2314_v4 = vadd.f32 %v3222_v54, %v4623_v34  ;;  %v2364_v44 = vrot.slane %v2363_v53, 4  ;;  %v2193_v55 = vpop.f32.mrb[37].mxu1  ;;  %v2086_v8 = vpop.f32.mrb[9].mxu0 }
 0x1d6   :  { %v2354_v43 = vrot.slane %v2353_v20, 1  ;;  %v2358_v41 = vmax.f32 %v2356_v31, %v2357_v12  ;;  %v2308_v50 = vadd.f32 %v4623_v34, %v2193_v55  ;;  %v2371_v18 = vrot.slane %v2370_v26, 4  ;;  %v3223_v35 = vpop.f32.mrb[38].mxu1  ;;  %v2088_v59 = vpop.f32.mrb[10].mxu0 }
 0x1d7   :  { %v2348_v33 = vmax.f32 %v2346_v32, %v2347_v29  ;;  %v2380_v5 = vrot.slane %v2379_v63, 2  ;;  %v2365_v19 = vmax.f32 %v2363_v53, %v2364_v44  ;;  %v2317_v62 = vadd.f32 %v3223_v35, %v4628_v46  ;;  %v2196_v13 = vpop.f32.mrb[39].mxu1  ;;  %v2090_v56 = vpop.f32.mrb[11].mxu0 }
 0x1d8   :  { %v2355_v61 = vmax.f32 %v2353_v20, %v2354_v43  ;;  %v2359_v25 = vrot.slane %v2358_v41, 2  ;;  %v2372_v6 = vmax.f32 %v2370_v26, %v2371_v18  ;;  %v2311_v11 = vadd.f32 %v4628_v46, %v2196_v13 }
 0x1d9   :  { %v4653_v54 = vadd.f32 %v4631_v28, %v2348_v33  ;;  %v2381_v31 = vmax.f32 %v2379_v63, %v2380_v5  ;;  %v2366_v12 = vrot.slane %v2365_v19, 2  ;;  %v2419_v55 = vmax.f32 %v2314_v4, %v2317_v62 }
 0x1da   :  { %v4656_v47 = vadd.f32 %v4644_v39, %v2355_v61  ;;  %v2360_v32 = vmax.f32 %v2358_v41, %v2359_v25  ;;  %v2373_v53 = vrot.slane %v2372_v6, 2  ;;  %v2398_v29 = vmax.f32 %v2308_v50, %v2311_v11 }
 0x1db   :  { %v2382_v20 = vrot.slane %v2381_v31, 1  ;;  %v2367_v43 = vmax.f32 %v2365_v19, %v2366_v12  ;;  %v2420_v26 = vrot.slane %v2419_v55, 4  ;;  %v3331_v41 = vadd.f32 %v2084_v16, %v4537_v23 }
 0x1dc   :  { %4884 = vst [vmem:[#allocation14_spill] sm:$0xff] %v4656_v47  ;;  %v2361_v35 = vrot.slane %v2360_v32, 1  ;;  %v2374_v33 = vmax.f32 %v2372_v6, %v2373_v53  ;;  %v2399_v13 = vrot.slane %v2398_v29, 4  ;;  %v3226_v63 = vpop.f32.mrb[40].mxu1  ;;  %v2094_v5 = vpop.f32.mrb[12].mxu0  ;;  %v3332_v19 = vadd.f32 %v2086_v8, %v4539_v38 }
 0x1dd   :  { %v2383_v4 = vmax.f32 %v2381_v31, %v2382_v20  ;;  %v2368_v62 = vrot.slane %v2367_v43, 1  ;;  %v2421_v61 = vmax.f32 %v2419_v55, %v2420_v26  ;;  %v2209_v25 = vpop.f32.mrb[41].mxu1  ;;  %v2096_v24 = vpop.f32.mrb[13].mxu0  ;;  %v2306_v31 = vadd.f32 %v3331_v41, %v4593_v51 }
 0x1de   :  { %v2362_v50 = vmax.f32 %v2360_v32, %v2361_v35  ;;  %v2375_v11 = vrot.slane %v2374_v33, 1  ;;  %v2400_v44 = vmax.f32 %v2398_v29, %v2399_v13  ;;  %v3227_v12 = vpop.f32.mrb[42].mxu1  ;;  %v4662_v30 = vpop.f32.mrb[14].mxu0  ;;  %v2307_v29 = vadd.f32 %v3332_v19, %v4604_v15 }
 0x1df   :  { %v2532_v6 = vadd.f32 %v4646_v2, %v2383_v4  ;;  %v2369_v53 = vmax.f32 %v2367_v43, %v2368_v62  ;;  %v2422_v18 = vrot.slane %v2421_v61, 2  ;;  %v2212_v20 = vpop.f32.mrb[43].mxu1  ;;  %v4666_v55 = vpop.f32.mrb[15].mxu0  ;;  %v2326_v35 = vadd.f32 %v3226_v63, %v4623_v34 }
 0x1e0   :  { %v2529_v23 = vadd.f32 %v4646_v2, %v2362_v50  ;;  %v2376_v16 = vmax.f32 %v2374_v33, %v2375_v11  ;;  %v2401_v32 = vrot.slane %v2400_v44, 2  ;;  %v3333_v62 = vadd.f32 %v2088_v59, %v4541_v9 }
 0x1e1   :  { %v2556_v26 = vmax.f32 %v2532_v6, 0.0  ;;  %v2530_v38 = vadd.f32 %v4631_v28, %v2369_v53  ;;  %v2423_v8 = vmax.f32 %v2421_v61, %v2422_v18  ;;  %v2320_v33 = vadd.f32 %v4623_v34, %v2209_v25 }
 0x1e2   :  { %v2553_v13 = vmax.f32 %v2529_v23, 0.0  ;;  %v2531_v43 = vadd.f32 %v4644_v39, %v2376_v16  ;;  %v2402_v4 = vmax.f32 %v2400_v44, %v2401_v32  ;;  %v2309_v19 = vadd.f32 %v3333_v62, %v4599_v36 }
 0x1e3   :  { %v2689_v41 = vrot.slane %v2556_v26, 7  ;;  %v2554_v47 = vmax.f32 %v2530_v38, 0.0  ;;  %v2424_v49 = vrot.slane %v2423_v8, 1  ;;  %v3334_v6 = vadd.f32 %v2090_v56, %v4543_v42 }
 0x1e4   :  { %v2555_v50 = vmax.f32 %v2531_v43, 0.0  ;;  %v2403_v11 = vrot.slane %v2402_v4, 1  ;;  %v3230_v18 = vpop.f32.mrb[44].mxu1  ;;  %v4677_v61 = vpop.f32.mrb[16].mxu0  ;;  %v2329_v9 = vadd.f32 %v3227_v12, %v4628_v46  ;;  %v2384_v32 = vmax.f32 %v2306_v31, %v2309_v19 }
 0x1e5   :  { %v4680_v63 = vsel %vm2655_vm13, %v2689_v41, %v2553_v13  ;;  %v2654_v44 = vrot.slane %v2554_v47, 7  ;;  %v2425_v53 = vmax.f32 %v2423_v8, %v2424_v49  ;;  %v2225_v59 = vpop.f32.mrb[45].mxu1  ;;  %v4683_v23 = vpop.f32.mrb[17].mxu0  ;;  %v2310_v26 = vadd.f32 %v3334_v6, %v4610_v7 }
 0x1e6   :  { %4885 = vst [vmem:[#allocation15_spill] sm:$0xff] %v4680_v63  ;;  %v4685_v25 = vrot.slane %v2555_v50, 7  ;;  %v2404_v16 = vmax.f32 %v2402_v4, %v2403_v11  ;;  %v3231_v42 = vpop.f32.mrb[46].mxu1  ;;  %v4688_v56 = vpop.f32.mrb[18].mxu0  ;;  %v4886_v38 = vmax.f32 %v4653_v54, 0.0  ;;  %v2461_v47 = vmax.f32 %v2326_v35, %v2329_v9 }
 0x1e7   :  { %v2538_v49 = vadd.f32 %v4646_v2, %v2425_v53  ;;  %v2323_v12 = vadd.f32 %v4628_v46, %v2212_v20  ;;  %v2228_v8 = vpop.f32.mrb[47].mxu1  ;;  %v4697_v43 = vpop.f32.mrb[19].mxu0  ;;  %v2385_v4 = vrot.slane %v2384_v32, 4  ;;  %v2391_v62 = vmax.f32 %v2307_v29, %v2310_v26 }
 0x1e8   :  { %v4693_v13 = vsel %vm2655_vm13, %v2654_v44, %v4886_v38  ;;  %v2535_v31 = vadd.f32 %v4646_v2, %v2404_v16  ;;  %v3335_v41 = vadd.f32 %v2094_v5, %v4547_v17  ;;  %v2462_v11 = vrot.slane %v2461_v47, 4 }
 0x1e9   :  { %v2562_v50 = vmax.f32 %v2538_v49, 0.0  ;;  %v2440_v54 = vmax.f32 %v2320_v33, %v2323_v12  ;;  %v3336_v19 = vadd.f32 %v2096_v24, %v4549_v52  ;;  %v2386_v44 = vmax.f32 %v2384_v32, %v2385_v4 }
 0x1ea   :  { %v2559_v6 = vmax.f32 %v2535_v31, 0.0  ;;  %v2392_v53 = vrot.slane %v2391_v62, 4  ;;  %v2312_v35 = vadd.f32 %v3335_v41, %v4593_v51  ;;  %v2463_v9 = vmax.f32 %v2461_v47, %v2462_v11 }
 0x1eb   :  { %v4703_v20 = vrot.slane %v2562_v50, 5  ;;  %v2441_v38 = vrot.slane %v2440_v54, 4  ;;  %v2313_v16 = vadd.f32 %v3336_v19, %v4604_v15  ;;  %v2387_v29 = vrot.slane %v2386_v44, 2 }
 0x1ec   :  { %v4706_v63 = vrot.slane %v2559_v6, 6  ;;  %v2393_v17 = vmax.f32 %v2391_v62, %v2392_v53  ;;  %v2338_v5 = vadd.f32 %v3230_v18, %v4623_v34  ;;  %v4709_v33 = vpop.f32.mrb[20].mxu0  ;;  %v2464_v52 = vrot.slane %v2463_v9, 2 }
 0x1ed   :  { %4887 = vst [vmem:[#allocation16_spill] sm:$0xff] %v4703_v20  ;;  %v2442_v24 = vmax.f32 %v2440_v54, %v2441_v38  ;;  %v3337_v32 = vadd.f32 %v4662_v30, %v4551_v27  ;;  %v2332_v26 = vadd.f32 %v4623_v34, %v2225_v59  ;;  %v4714_v49 = vpop.f32.mrb[21].mxu0  ;;  %v2388_v47 = vmax.f32 %v2386_v44, %v2387_v29 }
 0x1ee   :  { %v2394_v12 = vrot.slane %v2393_v17, 2  ;;  %v3338_v31 = vadd.f32 %v4666_v55, %v4553_v1  ;;  %v2341_v4 = vadd.f32 %v3231_v42, %v4628_v46  ;;  %v4719_v62 = vpop.f32.mrb[22].mxu0  ;;  %v2465_v18 = vmax.f32 %v2463_v9, %v2464_v52 }
 0x1ef   :  { %v2443_v41 = vrot.slane %v2442_v24, 2  ;;  %v2315_v50 = vadd.f32 %v3337_v32, %v4599_v36  ;;  %v2335_v11 = vadd.f32 %v4628_v46, %v2228_v8  ;;  %v4723_v27 = vpop.f32.mrb[23].mxu0  ;;  %v2389_v30 = vrot.slane %v2388_v47, 1 }
 0x1f0   :  { %v2395_v34 = vmax.f32 %v2393_v17, %v2394_v12  ;;  %v2316_v59 = vadd.f32 %v3338_v31, %v4610_v7  ;;  %v2503_v54 = vmax.f32 %v2338_v5, %v2341_v4  ;;  %v2466_v19 = vrot.slane %v2465_v18, 1 }
 0x1f1   :  { %v2444_v6 = vmax.f32 %v2442_v24, %v2443_v41  ;;  %v2405_v1 = vmax.f32 %v2312_v35, %v2315_v50  ;;  %v2482_v55 = vmax.f32 %v2332_v26, %v2335_v11  ;;  %v2390_v42 = vmax.f32 %v2388_v47, %v2389_v30 }
 0x1f2   :  { %v2396_v44 = vrot.slane %v2395_v34, 1  ;;  %v2412_v53 = vmax.f32 %v2313_v16, %v2316_v59  ;;  %v2504_v9 = vrot.slane %v2503_v54, 4  ;;  %v2467_v38 = vmax.f32 %v2465_v18, %v2466_v19 }
 0x1f3   :  { %v2445_v29 = vrot.slane %v2444_v6, 1  ;;  %v2406_v52 = vrot.slane %v2405_v1, 4  ;;  %v2483_v32 = vrot.slane %v2482_v55, 4  ;;  %v2533_v46 = vadd.f32 %v4631_v28, %v2390_v42 }
 0x1f4   :  { %v2397_v8 = vmax.f32 %v2395_v34, %v2396_v44  ;;  %v2413_v20 = vrot.slane %v2412_v53, 4  ;;  %v2505_v17 = vmax.f32 %v2503_v54, %v2504_v9  ;;  %v2124_v12 = vpop.f32.mrb[24].mxu0  ;;  %v2544_v5 = vadd.f32 %v4646_v2, %v2467_v38 }
 0x1f5   :  { %v2446_v31 = vmax.f32 %v2444_v6, %v2445_v29  ;;  %v2407_v24 = vmax.f32 %v2405_v1, %v2406_v52  ;;  %v2484_v35 = vmax.f32 %v2482_v55, %v2483_v32  ;;  %v2126_v26 = vpop.f32.mrb[25].mxu0  ;;  %v2557_v47 = vmax.f32 %v2533_v46, 0.0 }
 0x1f6   :  { %v2534_v16 = vadd.f32 %v4644_v39, %v2397_v8  ;;  %v2414_v4 = vmax.f32 %v2412_v53, %v2413_v20  ;;  %v2506_v18 = vrot.slane %v2505_v17, 2  ;;  %v4729_v41 = vpop.f32.mrb[26].mxu0  ;;  %v2568_v50 = vmax.f32 %v2544_v5, 0.0 }
 0x1f7   :  { %v2541_v11 = vadd.f32 %v4646_v2, %v2446_v31  ;;  %v2408_v30 = vrot.slane %v2407_v24, 2  ;;  %v2485_v34 = vrot.slane %v2484_v35, 2  ;;  %v2130_v59 = vpop.f32.mrb[27].mxu0  ;;  %v4732_v54 = vrot.slane %v2557_v47, 6 }
 0x1f8   :  { %v2558_v19 = vmax.f32 %v2534_v16, 0.0  ;;  %v2415_v6 = vrot.slane %v2414_v4, 2  ;;  %v2507_v1 = vmax.f32 %v2505_v17, %v2506_v18  ;;  %v4734_v55 = vrot.slane %v2568_v50, 3 }
 0x1f9   :  { %v2565_v42 = vmax.f32 %v2541_v11, 0.0  ;;  %v2409_v44 = vmax.f32 %v2407_v24, %v2408_v30  ;;  %v2486_v9 = vmax.f32 %v2484_v35, %v2485_v34  ;;  %v3339_v29 = vadd.f32 %v4677_v61, %v4556_v45 }
 0x1fa   :  { %v4736_v20 = vrot.slane %v2558_v19, 6  ;;  %v2416_v53 = vmax.f32 %v2414_v4, %v2415_v6  ;;  %v2508_v38 = vrot.slane %v2507_v1, 1  ;;  %v3340_v8 = vadd.f32 %v4683_v23, %v4558_v3 }
 0x1fb   :  { %v4740_v52 = vrot.slane %v2565_v42, 4  ;;  %v2410_v32 = vrot.slane %v2409_v44, 1  ;;  %v2487_v46 = vrot.slane %v2486_v9, 1  ;;  %v2318_v31 = vadd.f32 %v3339_v29, %v4593_v51 }
 0x1fc   :  { %v2417_v17 = vrot.slane %v2416_v53, 1  ;;  %v4744_v5 = vmax.f32 %v2507_v1, %v2508_v38  ;;  %v3341_v24 = vadd.f32 %v4688_v56, %v4560_v57  ;;  %v2134_v35 = vpop.f32.mrb[28].mxu0  ;;  %v2319_v45 = vadd.f32 %v3340_v8, %v4604_v15 }
 0x1fd   :  { %v2411_v47 = vmax.f32 %v2409_v44, %v2410_v32  ;;  %v2488_v16 = vmax.f32 %v2486_v9, %v2487_v46  ;;  %v3342_v61 = vadd.f32 %v4697_v43, %v4562_v10  ;;  %v2136_v4 = vpop.f32.mrb[29].mxu0  ;;  %v3343_v23 = vadd.f32 %v4709_v33, %v4564_v60 }
 0x1fe   :  { %v2418_v18 = vmax.f32 %v2416_v53, %v2417_v17  ;;  %v2321_v3 = vadd.f32 %v3341_v24, %v4599_v36  ;;  %v3344_v50 = vadd.f32 %v4714_v49, %v4566_v0  ;;  %v2138_v11 = vpop.f32.mrb[30].mxu0  ;;  %v3345_v10 = vadd.f32 %v4719_v62, %v4568_v48  ;;  %v4888_v24 = vld [vmem:[#allocation11_spill] sm:$0xff] }
 0x1ff   :  { %v2536_v57 = vadd.f32 %v4631_v28, %v2411_v47  ;;  %v4759_v56 = vadd.f32 %v4646_v2, %v2488_v16  ;;  %v2322_v30 = vadd.f32 %v3342_v61, %v4610_v7  ;;  %v2140_v43 = vpop.f32.mrb[31].mxu0  ;;  %v2324_v60 = vadd.f32 %v3343_v23, %v4593_v51 }
 0x200   :  { %v2537_v34 = vadd.f32 %v4644_v39, %v2418_v18  ;;  %v2426_v19 = vmax.f32 %v2318_v31, %v2321_v3  ;;  %v2325_v33 = vadd.f32 %v3344_v50, %v4604_v15  ;;  %v2327_v6 = vadd.f32 %v3345_v10, %v4599_v36  ;;  %v4890_v10 = vld [vmem:[#allocation13_spill] sm:$0xff] }
 0x201   :  { %v2560_v0 = vmax.f32 %v2536_v57, 0.0  ;;  %v2433_v49 = vmax.f32 %v2319_v45, %v2322_v30  ;;  %v3346_v1 = vadd.f32 %v4723_v27, %v4570_v14  ;;  %v3347_v9 = vadd.f32 %v2124_v12, %v4572_v21 }
 0x202   :  { %v2561_v42 = vmax.f32 %v2537_v34, 0.0  ;;  %v2427_v44 = vrot.slane %v2426_v19, 4  ;;  %v3348_v48 = vadd.f32 %v2126_v26, %v4574_v58  ;;  %v2447_v38 = vmax.f32 %v2324_v60, %v2327_v6 }
 0x203   :  { %v4772_v62 = vrot.slane %v2560_v0, 5  ;;  %v2434_v53 = vrot.slane %v2433_v49, 4  ;;  %v2328_v29 = vadd.f32 %v3346_v1, %v4610_v7  ;;  %v2330_v8 = vadd.f32 %v3347_v9, %v4593_v51 }
 0x204   :  { %v4775_v32 = vrot.slane %v2561_v42, 5  ;;  %v2428_v46 = vmax.f32 %v2426_v19, %v2427_v44  ;;  %v2331_v17 = vadd.f32 %v3348_v48, %v4604_v15  ;;  %v2448_v27 = vrot.slane %v2447_v38, 4 }
 0x205   :  { %v2435_v14 = vmax.f32 %v2433_v49, %v2434_v53  ;;  %v2454_v31 = vmax.f32 %v2325_v33, %v2328_v29  ;;  %v3349_v21 = vadd.f32 %v4729_v41, %v4576_v22  ;;  %v3350_v12 = vadd.f32 %v2130_v59, %v4578_v37 }
 0x206   :  { %v2429_v58 = vrot.slane %v2428_v46, 2  ;;  %v3351_v26 = vadd.f32 %v2134_v35, %v4580_v40  ;;  %v3352_v47 = vadd.f32 %v2136_v4, %v4888_v24  ;;  %v2449_v45 = vmax.f32 %v2447_v38, %v2448_v27  ;;  %v4889_v35 = vld [vmem:[#allocation12_spill] sm:$0xff] }
 0x207   :  { %v2436_v16 = vrot.slane %v2435_v14, 2  ;;  %v2455_v61 = vrot.slane %v2454_v31, 4  ;;  %v2333_v18 = vadd.f32 %v3349_v21, %v4599_v36  ;;  %v2334_v23 = vadd.f32 %v3350_v12, %v4610_v7 }
 0x208   :  { %v2430_v3 = vmax.f32 %v2428_v46, %v2429_v58  ;;  %v2336_v50 = vadd.f32 %v3351_v26, %v4593_v51  ;;  %v2337_v57 = vadd.f32 %v3352_v47, %v4604_v15  ;;  %v2450_v41 = vrot.slane %v2449_v45, 2 }
 0x209   :  { %v2437_v22 = vmax.f32 %v2435_v14, %v2436_v16  ;;  %v2456_v30 = vmax.f32 %v2454_v31, %v2455_v61  ;;  %v2468_v37 = vmax.f32 %v2330_v8, %v2333_v18  ;;  %v2475_v40 = vmax.f32 %v2331_v17, %v2334_v23  ;;  %v4891_v18 = vld [vmem:[#allocation14_spill] sm:$0xff] }
 0x20a   :  { %v2431_v59 = vrot.slane %v2430_v3, 1  ;;  %v3353_v4 = vadd.f32 %v2138_v11, %v4889_v35  ;;  %v3354_v34 = vadd.f32 %v2140_v43, %v4890_v10  ;;  %v2451_v60 = vmax.f32 %v2449_v45, %v2450_v41 }
 0x20b   :  { %v2438_v19 = vrot.slane %v2437_v22, 1  ;;  %v2457_v33 = vrot.slane %v2456_v30, 2  ;;  %v2469_v0 = vrot.slane %v2468_v37, 4  ;;  %v2476_v6 = vrot.slane %v2475_v40, 4 }
 0x20c   :  { %v2432_v49 = vmax.f32 %v2430_v3, %v2431_v59  ;;  %v2339_v51 = vadd.f32 %v3353_v4, %v4599_v36  ;;  %v2340_v15 = vadd.f32 %v3354_v34, %v4610_v7  ;;  %v2452_v42 = vrot.slane %v2451_v60, 1 }
 0x20d   :  { %v2439_v1 = vmax.f32 %v2437_v22, %v2438_v19  ;;  %v2458_v44 = vmax.f32 %v2456_v30, %v2457_v33  ;;  %v2470_v9 = vmax.f32 %v2468_v37, %v2469_v0  ;;  %v2477_v48 = vmax.f32 %v2475_v40, %v2476_v6 }
 0x20e   :  { %v2539_v11 = vadd.f32 %v4631_v28, %v2432_v49  ;;  %v2489_v43 = vmax.f32 %v2336_v50, %v2339_v51  ;;  %v2496_v53 = vmax.f32 %v2337_v57, %v2340_v15  ;;  %v2453_v29 = vmax.f32 %v2451_v60, %v2452_v42 }
 0x20f   :  { %v2540_v38 = vadd.f32 %v4644_v39, %v2439_v1  ;;  %v2459_v46 = vrot.slane %v2458_v44, 1  ;;  %v2471_v8 = vrot.slane %v2470_v9, 2  ;;  %v2478_v36 = vrot.slane %v2477_v48, 2 }
 0x210   :  { %v2563_v17 = vmax.f32 %v2539_v11, 0.0  ;;  %v2490_v14 = vrot.slane %v2489_v43, 4  ;;  %v2497_v7 = vrot.slane %v2496_v53, 4  ;;  %v2542_v31 = vadd.f32 %v4631_v28, %v2453_v29  ;;  %v4893_v11 = vld [vmem:[#allocation15_spill] sm:$0xff] }
 0x211   :  { %v2564_v27 = vmax.f32 %v2540_v38, 0.0  ;;  %v2460_v21 = vmax.f32 %v2458_v44, %v2459_v46  ;;  %v2472_v58 = vmax.f32 %v2470_v9, %v2471_v8  ;;  %v2479_v26 = vmax.f32 %v2477_v48, %v2478_v36  ;;  %v4894_v38 = vld [vmem:[#allocation16_spill] sm:$0xff] }
 0x212   :  { %v2663_v12 = vrot.slane %v2563_v17, 4  ;;  %v2491_v24 = vmax.f32 %v2489_v43, %v2490_v14  ;;  %v2498_v47 = vmax.f32 %v2496_v53, %v2497_v7  ;;  %v2566_v16 = vmax.f32 %v2542_v31, 0.0 }
 0x213   :  { %v2473_v45 = vrot.slane %v2472_v58, 1  ;;  %v2543_v61 = vadd.f32 %v4644_v39, %v2460_v21  ;;  %v4892_v3 = vmax.f32 %v4891_v18, 0.0  ;;  %v2480_v50 = vrot.slane %v2479_v26, 1  ;;  %v2612_v18 = vld [vmem:[#allocation5 + $0x128] sm:$0xff] }
 0x214   :  { %v2492_v57 = vrot.slane %v2491_v24, 2  ;;  %v2499_v22 = vrot.slane %v2498_v47, 2  ;;  %v2666_v30 = vrot.slane %v2566_v16, 3  ;;  %v2681_v34 = vrot.slane %v2564_v27, 4  ;;  %v2608_v27 = vld [vmem:[#allocation5 + $0x108] sm:$0xff] }
 0x215   :  { %v2676_v23 = vsel %vm2655_vm13, %v4685_v25, %v4892_v3  ;;  %v2474_v37 = vmax.f32 %v2472_v58, %v2473_v45  ;;  %v2567_v59 = vmax.f32 %v2543_v61, 0.0  ;;  %v2481_v35 = vmax.f32 %v2479_v26, %v2480_v50  ;;  %v2611_v61 = vld [vmem:[#allocation5 + $0x120] sm:$0xff]  ;;  %v2614_v50 = vld [vmem:[#allocation5 + $0x138] sm:$0xff] }
 0x216   :  { %v2678_v41 = vsel %vm2658_vm14, %v4736_v20, %v2676_v23  ;;  %v2493_v4 = vmax.f32 %v2491_v24, %v2492_v57  ;;  %v2500_v10 = vmax.f32 %v2498_v47, %v2499_v22  ;;  %v2659_v60 = vsel %vm2658_vm14, %v4732_v54, %v4693_v13  ;;  %v2609_v24 = vld [vmem:[#allocation5 + $0x110] sm:$0xff]  ;;  %v2610_v47 = vld [vmem:[#allocation5 + $0x118] sm:$0xff]  ;;  %v2615_v22 = vld [vmem:[#allocation5 + $0x140] sm:$0xff] }
 0x217   :  { %v2680_v40 = vsel %vm2661_vm15, %v4775_v32, %v2678_v41  ;;  %v2545_v25 = vadd.f32 %v4631_v28, %v2474_v37  ;;  %v2683_v19 = vrot.slane %v2567_v59, 3  ;;  %v2550_v20 = vadd.f32 %v4646_v2, %v4744_v5  ;;  %v2613_v23 = vld [vmem:[#allocation5 + $0x130] sm:$0xff]  ;;  %v2616_v41 = vld [vmem:[#allocation5 + $0x148] sm:$0xff]  ;;  %v2618_v59 = vld [vmem:[#allocation5 + $0x158] sm:$0xff] }
 0x218   :  { %v2494_v33 = vrot.slane %v2493_v4, 1  ;;  %v2501_v0 = vrot.slane %v2500_v10, 1  ;;  %v2546_v49 = vadd.f32 %v4644_v39, %v2481_v35  ;;  %v2682_v32 = vsel %vm2664_vm0, %v2681_v34, %v2680_v40  ;;  %v2617_v37 = vld [vmem:[#allocation5 + $0x150] sm:$0xff]  ;;  %v2619_v35 = vld [vmem:[#allocation5 + $0x160] sm:$0xff] }
 0x219   :  { %v2684_v6 = vsel %vm2667_vm1, %v2683_v19, %v2682_v32  ;;  %v2569_v51 = vmax.f32 %v2545_v25, 0.0  ;;  %v2662_v15 = vsel %vm2661_vm15, %v4772_v62, %v2659_v60  ;;  %v2571_v1 = vmax.f32 %v4759_v56, 0.0  ;;  %v2621_v34 = vld [vmem:[#allocation5 + $0x170] sm:$0xff]  ;;  %v2622_v25 = vld [vmem:[#allocation5 + $0x178] sm:$0xff] }
 0x21a   :  { %v2495_v42 = vmax.f32 %v2493_v4, %v2494_v33  ;;  %v2502_v44 = vmax.f32 %v2500_v10, %v2501_v0  ;;  %v2570_v13 = vmax.f32 %v2546_v49, 0.0  ;;  %v2665_v54 = vsel %vm2664_vm0, %v2663_v12, %v2662_v15  ;;  %v2620_v4 = vld [vmem:[#allocation5 + $0x168] sm:$0xff]  ;;  %v3029_v0 = vld [vmem:[%s4862_s5] ss:$0 sm:$0xff] }
 0x21b   :  { %v2668_v2 = vsel %vm2667_vm1, %v2666_v30, %v2665_v54  ;;  %v2669_v5 = vrot.slane %v2569_v51, 2  ;;  %v2574_v9 = vmax.f32 %v2550_v20, 0.0  ;;  %v2692_v48 = vsel %vm2658_vm14, %v4706_v63, %v4893_v11  ;;  %v2607_v63 = vld [vmem:[#allocation5 + $0x100] sm:$0xff] }
 0x21c   :  { %v2549_v43 = vadd.f32 %v4644_v39, %v2502_v44  ;;  %v2685_v53 = vrot.slane %v2570_v13, 2  ;;  %v2548_v62 = vadd.f32 %v4631_v28, %v2495_v42  ;;  %v2694_v56 = vsel %vm2661_vm15, %v4894_v38, %v2692_v48 }
 0x21d   :  { %v2671_v29 = vsel %vm2670_vm2, %v2669_v5, %v2668_v2  ;;  %v2696_v46 = vsel %vm2664_vm0, %v4740_v52, %v2694_v56  ;;  %v2699_v8 = vrot.slane %v2571_v1, 2  ;;  %v2701_v17 = vrot.slane %v2574_v9, 1 }
 0x21e   :  { %v2573_v36 = vmax.f32 %v2549_v43, 0.0  ;;  %v2686_v14 = vsel %vm2670_vm2, %v2685_v53, %v2684_v6  ;;  %v2572_v7 = vmax.f32 %v2548_v62, 0.0  ;;  %v2698_v39 = vsel %vm2667_vm1, %v4734_v55, %v2696_v46 }
 0x21f   :  { %v2700_v28 = vsel %vm2670_vm2, %v2699_v8, %v2698_v39  ;;  %v3300_v12 = vpack.c.bf16 %v2608_v27, %v2607_v63  ;;  %v3303_v16 = vpack.c.bf16 %v2610_v47, %v2609_v24  ;;  %v3657_v45 = vmov 0.0  }
 0x220   :  { %v2687_v31 = vrot.slane %v2573_v36, 1  ;;  %v2672_v21 = vrot.slane %v2572_v7, 1  ;;  %v2702_v58 = vsel %vm2673_vm3, %v2701_v17, %v2700_v28  ;;  %v4895_v55 = vmov 0.0|0.0  }
 0x221   :  { %v3306_v3 = vpack.c.bf16 %v2612_v18, %v2611_v61  ;;  %v3309_v57 = vpack.c.bf16 %v2614_v50, %v2613_v23  ;;  %v3312_v30 = vpack.c.bf16 %v2616_v41, %v2615_v22  ;;  %v3315_v40 = vpack.c.bf16 %v2618_v59, %v2617_v37 }
 0x222   :  { %v2688_v52 = vsel %vm2673_vm3, %v2687_v31, %v2686_v14  ;;  %v2674_v26 = vsel %vm2673_vm3, %v2672_v21, %v2671_v29  ;;  %v3318_v10 = vpack.c.bf16 %v2620_v4, %v2619_v35  ;;  %v3321_v19 = vpack.c.bf16 %v2622_v25, %v2621_v34 }
 0x223   :  { %2770 = vmatprep.mubr.f32.mxu1 %v2688_v52 }
 0x224   :  { %2771 = vmatmul.mubr.f32.vlgmr.msra.gmra.mrb[48].mxu1 %v2674_v26 }
 0x225   :  { %3301 = vmatpush3.bf16.msra.mxu1 %v3300_v12  ;;  %3264 = vmatprep.mubr.msk.f32.mxu1 %vm3656_vm4, %v3657_v45 }
 0x226   :  { %3302 = vmatprep.subr.bf16.mxu1 %v4895_v55 }
 0x229   :  { %3304 = vmatpush3.bf16.msra.mxu1 %v3303_v16 }
 0x22a   :  { %3305 = vmatprep.subr.bf16.mxu1 %v4895_v55 }
 0x22d   :  { %3307 = vmatpush3.bf16.msra.mxu1 %v3306_v3 }
 0x22e   :  { %3308 = vmatprep.subr.bf16.mxu1 %v4895_v55 }
 0x231   :  { %3310 = vmatpush3.bf16.msra.mxu1 %v3309_v57 }
 0x232   :  { %3311 = vmatprep.subr.bf16.mxu1 %v4895_v55 }
 0x235   :  { %3313 = vmatpush3.bf16.msra.mxu1 %v3312_v30 }
 0x236   :  { %3314 = vmatprep.subr.bf16.mxu1 %v4895_v55 }
 0x239   :  { %3316 = vmatpush3.bf16.msra.mxu1 %v3315_v40 }
 0x23a   :  { %3317 = vmatprep.subr.bf16.mxu1 %v4895_v55 }
 0x23d   :  { %3319 = vmatpush3.bf16.msra.mxu1 %v3318_v10 }
 0x23e   :  { %3320 = vmatprep.subr.bf16.mxu1 %v4895_v55 }
 0x241   :  { %3322 = vmatpush3.bf16.msra.mxu1 %v3321_v19 }
 0x244   :  { %3265 = vmatmul.mubr.f32.vlgmr.msra.gmra.mrb[50].mxu1 %v2702_v58 }
 0x2f7   :  { %v3112_v60 = vpop.f32.mrb[48].mxu1 }
 0x2f8   :  { %v3113_v20 = vpop.f32.mrb[49].mxu1 }
 0x2f9   :  { %v3114_v33 = vadd.f32 %v3113_v20, %v3112_v60 }
 0x2fb   :  { %v2773_v49 = vadd.f32 %v3114_v33, %v3029_v0 }
 0x317   :  { %v2842_v32 = vpop.f32.mrb[50].mxu1 }
 0x318   :  { %v2843_v6 = vadd.f32 %v2842_v32, %v2773_v49  ;;  %v3266_v51 = vpop.f32.mrb[51].mxu1 }
 0x31a   :  { %2846 = vst [vmem:[#allocation7] sm:$0xff] %v2843_v6 }
 0x31b   :  { %3631 = shalt.err (!%p3628_p6)
}
 0x31c   :  { %s3632_s13 = scalar_lea.hbm %s4863_s6, 128 }
 0x31d   :  { %p3633_p7 = scmp.ne.s32.totalorder %s4863_s6, %s3632_s13  ;;  %p3636_p8 = scmp.lt.u32.totalorder %s3632_s13, %s4863_s6 }
 0x31f   :  { %p3638_p9 = pnand %p3636_p8, %p3633_p7 }
 0x321   :  { %3641 = shalt.err (!%p3638_p9)
}
 0x322   :  { %2856 = dma.vmem_to_hbm [thread:$0]  %s2854_s9, 128, %s4863_s6, [#allocation4]  }
 0x323   :  { %3646 = dma.done.wait [#allocation4], 128  }
 0x324   :  { %3647 = vsyncadd [#allocation4], 4294967168 }
 0x325   :  { %2860 = vsyncpa [#allocation3], 1 }
 0x326   :  { %2861 = vsyncpa [#allocation6], 1 }
 0x327   :  { %2862 = vsyncpa [#allocation4], 1 }

</bundles_post_ra>
